<compile_context>
chip_gen: v6e
topology: v6e:2x2x1
jax: 0.10.0
libtpu: 0.0.40
codegen_flags: <defaults>
</compile_context>

<pallas_src>
import functools

import numpy as np
import jax
import jax.numpy as jnp
from jax.experimental import pallas as pl
from jax.experimental.pallas import tpu as pltpu

ALPHA = 0.5
PEAK_WEIGHT = 1.0  # default of the (unshown) WeightedLoss


# ----------------------------------------------------------------------------
# CWT filter-bank construction (glue: plain numpy, deterministic).
# Build this ONCE per config and reuse / close over it under jit — do not
# rebuild per training step.
# ----------------------------------------------------------------------------
def ricker(points, a):
    """scipy.signal.ricker"""
    A = 2.0 / (np.sqrt(3.0 * a) * np.pi ** 0.25)
    vec = np.arange(points) - (points - 1.0) / 2.0
    xsq = vec ** 2
    wsq = a ** 2
    mod = 1.0 - xsq / wsq
    gauss = np.exp(-xsq / (2.0 * wsq))
    return (A * mod * gauss).astype(np.float32)


def build_cwt_bank(L, widths):
    """Toeplitz bank T of shape (L, S*L):  cwt[n, s*L + t] = (x_n * ricker_s)[t]
    with 'same'-mode convolution, matching scipy.signal.cwt.  Returns f32."""
    S = len(widths)
    bank = np.zeros((L, S * L), dtype=np.float32)
    m = np.arange(L)[:, None]   # input sample index
    n = np.arange(L)[None, :]   # output time index
    for si, w in enumerate(widths):
        M = int(min(10 * w, L))
        k = ricker(M, float(w))
        off = (M - 1) // 2
        idx = n + off - m
        valid = (idx >= 0) & (idx < M)
        bank[:, si * L:(si + 1) * L] = np.where(
            valid, k[np.clip(idx, 0, M - 1)], 0.0).astype(np.float32)
    return bank


# ----------------------------------------------------------------------------
# Config helpers (static, Python-level)
# ----------------------------------------------------------------------------
def _tensorcores_per_chip():
    """v7x exposes 2 TensorCores/chip; v5e/v6e have 1."""
    try:
        kind = jax.devices()[0].device_kind.lower()
        if "v7" in kind:
            return 2
    except Exception:
        pass
    return 1


def _pick_num_scale_blocks(S, L, *, tc_blocks=1, bank_elem_bytes=2,
                           vmem_budget_bytes=24 << 20):
    """Smallest divisor of S >= tc_blocks whose per-block (double-buffered)
    bank slice fits the scoped-VMEM budget (keeps v7x's 64 MiB VMEM safe)."""
    nb = max(1, tc_blocks)
    while nb <= S:
        per_block = 2 * bank_elem_bytes * L * (S // nb) * L   # double-buffered
        if S % nb == 0 and per_block <= vmem_budget_bytes:
            return nb
        nb += 1
    return S


def _pick_chunk_scales(sb, L, target_lanes=1152):
    """Largest divisor of sb whose lane width (d*L) stays <= ~1152 lanes
    (4-9 f32 vregs live per chunk)."""
    best = 1
    for d in range(1, sb + 1):
        if sb % d == 0 and d * L <= max(target_lanes, L):
            best = d
    return best


# ----------------------------------------------------------------------------
# Pallas kernel — one grid step per scale block, chunked CWT reduction.
# ----------------------------------------------------------------------------
def _loss_kernel(io_ref, bank_ref, out_ref, *,
                 peak_weight, chunk_lanes, num_chunks):
    # io_ref:   (2, N, L) f32   [0]=outputs, [1]=targets
    # bank_ref: (L, SB*L) bf16  this scale-block's slice of the Ricker bank
    # out_ref:  (1, 8, 128) f32 per-block partials: [0,0,0]=sum|cwt(diff)|,
    #                           [0,0,1]=waveform weighted-L1 (block 0 only)
    o = io_ref[0]                       # (N, L) f32
    t = io_ref[1]                       # (N, L) f32
    diff = o - t
    diff_b = diff.astype(bank_ref.dtype)  # bf16 for the MXU

    # Chunked CWT abs-sum: never materialize the full (N, SB*L) f32 result.
    # Static lane slices of the bank ref are zero-cost views; the loop is
    # fully unrolled so the scheduler can overlap chunk i's abs/reduce with
    # chunk i+1's matmul.
    acc = jnp.float32(0.0)
    for c in range(num_chunks):
        blk = bank_ref[:, c * chunk_lanes:(c + 1) * chunk_lanes]   # (L, CW) bf16
        part = jnp.dot(diff_b, blk,
                       preferred_element_type=jnp.float32)          # (N, CW) f32
        acc = acc + jnp.sum(jnp.abs(part))

    sub = jax.lax.broadcasted_iota(jnp.int32, out_ref.shape, 1)
    lane = jax.lax.broadcasted_iota(jnp.int32, out_ref.shape, 2)
    is00 = (sub == 0) & (lane == 0)
    is01 = (sub == 0) & (lane == 1)
    out_ref[...] = jnp.where(is00, acc, 0.0)

    # Waveform weighted-L1 only on the first scale block (f32 VPU math — v5e
    # has no bf16 VPU).
    @pl.when(pl.program_id(0) == 0)
    def _():
        w = 1.0 + peak_weight * jnp.abs(t)
        wl1 = jnp.sum(w * jnp.abs(diff)) / jnp.sum(w)
        out_ref[...] = out_ref[...] + jnp.where(is01, wl1, 0.0)


def weighted_combined_loss(outputs, targets, bank_bf16, *,
                           alpha=ALPHA, peak_weight=PEAK_WEIGHT,
                           num_scale_blocks=None):
    B, C, L = outputs.shape
    N = B * C
    S = bank_bf16.shape[1] // L

    if num_scale_blocks is None:
        num_scale_blocks = _pick_num_scale_blocks(
            S, L, tc_blocks=_tensorcores_per_chip(),
            bank_elem_bytes=jnp.dtype(bank_bf16.dtype).itemsize)
    NB = int(num_scale_blocks)
    assert S % NB == 0, "num_scale_blocks must divide the number of scales"
    SB = S // NB

    chunk_scales = _pick_chunk_scales(SB, L)
    chunk_lanes = chunk_scales * L
    num_chunks = SB // chunk_scales

    o2 = outputs.reshape(N, L).astype(jnp.float32)
    t2 = targets.reshape(N, L).astype(jnp.float32)
    io = jnp.stack([o2, t2], axis=0)            # (2, N, L): one input DMA

    kernel = functools.partial(
        _loss_kernel, peak_weight=float(peak_weight),
        chunk_lanes=chunk_lanes, num_chunks=num_chunks)

    parts = pl.pallas_call(
        kernel,
        out_shape=jax.ShapeDtypeStruct((NB, 8, 128), jnp.float32),
        grid_spec=pltpu.PrefetchScalarGridSpec(
            num_scalar_prefetch=0,
            grid=(NB,),                                    # scale blocks
            in_specs=[
                pl.BlockSpec((2, N, L), lambda b: (0, 0, 0)),       # io (replicated)
                pl.BlockSpec((L, SB * L), lambda b: (0, b)),        # bank slice b
            ],
            out_specs=pl.BlockSpec((1, 8, 128), lambda b: (b, 0, 0)),
        ),
        compiler_params=pltpu.CompilerParams(
            dimension_semantics=("parallel",)),            # megacore on v7x
    )(io, bank_bf16)

    wl1_waveform = parts[0, 0, 1]
    cwt_abs_sum = jnp.sum(parts[:, 0, 0])
    l1_cwt = cwt_abs_sum / jnp.float32(N * S * L)
    return alpha * wl1_waveform + (1.0 - alpha) * l1_cwt


# ----------------------------------------------------------------------------
# Pure-JAX reference (same math, f32 throughout, for sanity check)
# ----------------------------------------------------------------------------
def reference_loss(outputs, targets, bank_f32, *,
                   alpha=ALPHA, peak_weight=PEAK_WEIGHT):
    L = outputs.shape[-1]
    o = outputs.reshape(-1, L).astype(jnp.float32)
    t = targets.reshape(-1, L).astype(jnp.float32)
    w = 1.0 + peak_weight * jnp.abs(t)
    wl1 = jnp.sum(w * jnp.abs(o - t)) / jnp.sum(w)
    cwt_o = o @ bank_f32
    cwt_t = t @ bank_f32
    l1_cwt = jnp.mean(jnp.abs(cwt_o - cwt_t))
    return alpha * wl1 + (1.0 - alpha) * l1_cwt


if __name__ == "__main__":
    B, C, L = 2, 4, 128
    scales = np.arange(1, 37)            # module default: np.arange(1, 37)

    key = jax.random.PRNGKey(0)
    k_o, k_t = jax.random.split(key)
    outputs = jax.random.normal(k_o, (B, C, L), dtype=jnp.float32)
    targets = jax.random.normal(k_t, (B, C, L), dtype=jnp.float32)

    bank_np = build_cwt_bank(L, scales)              # (L, S*L) f32 numpy
    bank_f32 = jnp.asarray(bank_np)                  # reference copy
    bank_bf16 = jnp.asarray(bank_np, dtype=jnp.bfloat16)  # kernel copy (built once)

    loss = weighted_combined_loss(outputs, targets, bank_bf16)
    loss = jax.block_until_ready(loss)

    ref = jax.block_until_ready(reference_loss(outputs, targets, bank_f32))
    np.testing.assert_allclose(np.asarray(loss), np.asarray(ref),
                               rtol=1e-2, atol=1e-2)

    print("KERNEL_OK")
</pallas_src>

<mosaic_0001>
module attributes {stable_mosaic.version = 11 : i64} {
  func.func @_loss_kernel(%arg0: i32, %arg1: memref<2x8x128xf32, #tpu.memory_space<vmem>>, %arg2: memref<128x4608xbf16, #tpu.memory_space<vmem>>, %arg3: memref<1x8x128xf32, #tpu.memory_space<vmem>>) attributes {dimension_semantics = [#tpu.dimension_semantics<parallel>], iteration_bounds = array<i64: 1>, scalar_prefetch = 0 : i64, scratch_operands = 0 : i64, tpu.core_type = #tpu.core_type<tc>, window_params = [{pipeline_mode = #tpu.pipeline_mode<synchronous>, transform_indices = @transform_0, window_bounds = array<i64: 2, 8, 128>}, {transform_indices = @transform_1, window_bounds = array<i64: 128, 4608>}, {transform_indices = @transform_2, window_bounds = array<i64: 1, 8, 128>}]} {
    %c0 = arith.constant 0 : index
    %c0_0 = arith.constant 0 : index
    %c0_1 = arith.constant 0 : index
    %0 = vector.load %arg1[%c0, %c0_0, %c0_1] : memref<2x8x128xf32, #tpu.memory_space<vmem>>, vector<1x8x128xf32>
    %1 = vector.shape_cast %0 : vector<1x8x128xf32> to vector<8x128xf32>
    %c1 = arith.constant 1 : index
    %c0_2 = arith.constant 0 : index
    %c0_3 = arith.constant 0 : index
    %2 = vector.load %arg1[%c1, %c0_2, %c0_3] : memref<2x8x128xf32, #tpu.memory_space<vmem>>, vector<1x8x128xf32>
    %3 = vector.shape_cast %2 : vector<1x8x128xf32> to vector<8x128xf32>
    %4 = arith.subf %1, %3 : vector<8x128xf32>
    %5 = arith.truncf %4 : vector<8x128xf32> to vector<8x128xbf16>
    %c0_4 = arith.constant 0 : index
    %c0_5 = arith.constant 0 : index
    %6 = vector.load %arg2[%c0_4, %c0_5] : memref<128x4608xbf16, #tpu.memory_space<vmem>>, vector<128x1152xbf16>
    %cst = arith.constant dense<0.000000e+00> : vector<8x1152xf32>
    %7 = tpu.matmul %5, %6, %cst {dimension_numbers = #tpu.dot_dimension_numbers<[1], [0], [0], [1], [0, 0, 1, 1], [], []>} : vector<8x128xbf16>, vector<128x1152xbf16>, vector<8x1152xf32> -> vector<8x1152xf32>
    %8 = math.absf %7 : vector<8x1152xf32>
    %9 = vector.shape_cast %8 : vector<8x1152xf32> to vector<1x8x1152xf32>
    %cst_6 = arith.constant dense<0.000000e+00> : vector<1xf32>
    %10 = vector.multi_reduction <add>, %9, %cst_6 [1, 2] : vector<1x8x1152xf32> to vector<1xf32>
    %11 = vector.shape_cast %10 : vector<1xf32> to vector<1x1x1xf32>
    %12 = vector.extract %11[0, 0, 0] : f32 from vector<1x1x1xf32>
    %cst_7 = arith.constant 0.000000e+00 : f32
    %13 = arith.addf %cst_7, %12 : f32
    %c0_8 = arith.constant 0 : index
    %c1152 = arith.constant 1152 : index
    %14 = vector.load %arg2[%c0_8, %c1152] : memref<128x4608xbf16, #tpu.memory_space<vmem>>, vector<128x1152xbf16>
    %cst_9 = arith.constant dense<0.000000e+00> : vector<8x1152xf32>
    %15 = tpu.matmul %5, %14, %cst_9 {dimension_numbers = #tpu.dot_dimension_numbers<[1], [0], [0], [1], [0, 0, 1, 1], [], []>} : vector<8x128xbf16>, vector<128x1152xbf16>, vector<8x1152xf32> -> vector<8x1152xf32>
    %16 = math.absf %15 : vector<8x1152xf32>
    %17 = vector.shape_cast %16 : vector<8x1152xf32> to vector<1x8x1152xf32>
    %cst_10 = arith.constant dense<0.000000e+00> : vector<1xf32>
    %18 = vector.multi_reduction <add>, %17, %cst_10 [1, 2] : vector<1x8x1152xf32> to vector<1xf32>
    %19 = vector.shape_cast %18 : vector<1xf32> to vector<1x1x1xf32>
    %20 = vector.extract %19[0, 0, 0] : f32 from vector<1x1x1xf32>
    %21 = arith.addf %13, %20 : f32
    %c0_11 = arith.constant 0 : index
    %c2304 = arith.constant 2304 : index
    %22 = vector.load %arg2[%c0_11, %c2304] : memref<128x4608xbf16, #tpu.memory_space<vmem>>, vector<128x1152xbf16>
    %cst_12 = arith.constant dense<0.000000e+00> : vector<8x1152xf32>
    %23 = tpu.matmul %5, %22, %cst_12 {dimension_numbers = #tpu.dot_dimension_numbers<[1], [0], [0], [1], [0, 0, 1, 1], [], []>} : vector<8x128xbf16>, vector<128x1152xbf16>, vector<8x1152xf32> -> vector<8x1152xf32>
    %24 = math.absf %23 : vector<8x1152xf32>
    %25 = vector.shape_cast %24 : vector<8x1152xf32> to vector<1x8x1152xf32>
    %cst_13 = arith.constant dense<0.000000e+00> : vector<1xf32>
    %26 = vector.multi_reduction <add>, %25, %cst_13 [1, 2] : vector<1x8x1152xf32> to vector<1xf32>
    %27 = vector.shape_cast %26 : vector<1xf32> to vector<1x1x1xf32>
    %28 = vector.extract %27[0, 0, 0] : f32 from vector<1x1x1xf32>
    %29 = arith.addf %21, %28 : f32
    %c0_14 = arith.constant 0 : index
    %c3456 = arith.constant 3456 : index
    %30 = vector.load %arg2[%c0_14, %c3456] : memref<128x4608xbf16, #tpu.memory_space<vmem>>, vector<128x1152xbf16>
    %cst_15 = arith.constant dense<0.000000e+00> : vector<8x1152xf32>
    %31 = tpu.matmul %5, %30, %cst_15 {dimension_numbers = #tpu.dot_dimension_numbers<[1], [0], [0], [1], [0, 0, 1, 1], [], []>} : vector<8x128xbf16>, vector<128x1152xbf16>, vector<8x1152xf32> -> vector<8x1152xf32>
    %32 = math.absf %31 : vector<8x1152xf32>
    %33 = vector.shape_cast %32 : vector<8x1152xf32> to vector<1x8x1152xf32>
    %cst_16 = arith.constant dense<0.000000e+00> : vector<1xf32>
    %34 = vector.multi_reduction <add>, %33, %cst_16 [1, 2] : vector<1x8x1152xf32> to vector<1xf32>
    %35 = vector.shape_cast %34 : vector<1xf32> to vector<1x1x1xf32>
    %36 = vector.extract %35[0, 0, 0] : f32 from vector<1x1x1xf32>
    %37 = arith.addf %29, %36 : f32
    %38 = tpu.iota {dimensions = array<i32: 1>} : vector<1x8x128xi32>
    %39 = tpu.iota {dimensions = array<i32: 2>} : vector<1x8x128xi32>
    %c0_i32 = arith.constant 0 : i32
    %40 = vector.broadcast %c0_i32 : i32 to vector<1x8x128xi32>
    %41 = arith.cmpi eq, %38, %40 : vector<1x8x128xi32>
    %c0_i32_17 = arith.constant 0 : i32
    %42 = vector.broadcast %c0_i32_17 : i32 to vector<1x8x128xi32>
    %43 = arith.cmpi eq, %39, %42 : vector<1x8x128xi32>
    %44 = arith.andi %41, %43 : vector<1x8x128xi1>
    %c0_i32_18 = arith.constant 0 : i32
    %45 = vector.broadcast %c0_i32_18 : i32 to vector<1x8x128xi32>
    %46 = arith.cmpi eq, %38, %45 : vector<1x8x128xi32>
    %c1_i32 = arith.constant 1 : i32
    %47 = vector.broadcast %c1_i32 : i32 to vector<1x8x128xi32>
    %48 = arith.cmpi eq, %39, %47 : vector<1x8x128xi32>
    %49 = arith.andi %46, %48 : vector<1x8x128xi1>
    %cst_19 = arith.constant 0.000000e+00 : f32
    %50 = vector.broadcast %37 : f32 to vector<1x8x128xf32>
    %51 = vector.broadcast %cst_19 : f32 to vector<1x8x128xf32>
    %52 = arith.select %44, %50, %51 : vector<1x8x128xi1>, vector<1x8x128xf32>
    %c0_20 = arith.constant 0 : index
    %c0_21 = arith.constant 0 : index
    %c0_22 = arith.constant 0 : index
    %53 = vector.load %arg3[%c0_20, %c0_21, %c0_22] : memref<1x8x128xf32, #tpu.memory_space<vmem>>, vector<1x8x128xf32>
    tpu.vector_store %arg3[%c0_20, %c0_21, %c0_22], %52 {strides = array<i32>} : memref<1x8x128xf32, #tpu.memory_space<vmem>>, vector<1x8x128xf32>,
    %c0_i32_23 = arith.constant 0 : i32
    %54 = arith.cmpi eq, %arg0, %c0_i32_23 : i32
    %55 = arith.extui %54 : i1 to i32
    %c0_i32_24 = arith.constant 0 : i32
    %56 = arith.cmpi ne, %55, %c0_i32_24 : i32
    scf.if %56 {
      %57 = math.absf %3 : vector<8x128xf32>
      %cst_25 = arith.constant 1.000000e+00 : f32
      %58 = vector.broadcast %cst_25 : f32 to vector<8x128xf32>
      %59 = arith.mulf %58, %57 : vector<8x128xf32>
      %cst_26 = arith.constant 1.000000e+00 : f32
      %60 = vector.broadcast %cst_26 : f32 to vector<8x128xf32>
      %61 = arith.addf %60, %59 : vector<8x128xf32>
      %62 = math.absf %4 : vector<8x128xf32>
      %63 = arith.mulf %61, %62 : vector<8x128xf32>
      %64 = vector.shape_cast %63 : vector<8x128xf32> to vector<1x8x128xf32>
      %cst_27 = arith.constant dense<0.000000e+00> : vector<1xf32>
      %65 = vector.multi_reduction <add>, %64, %cst_27 [1, 2] : vector<1x8x128xf32> to vector<1xf32>
      %66 = vector.shape_cast %65 : vector<1xf32> to vector<1x1x1xf32>
      %67 = vector.extract %66[0, 0, 0] : f32 from vector<1x1x1xf32>
      %68 = vector.shape_cast %61 : vector<8x128xf32> to vector<1x8x128xf32>
      %cst_28 = arith.constant dense<0.000000e+00> : vector<1xf32>
      %69 = vector.multi_reduction <add>, %68, %cst_28 [1, 2] : vector<1x8x128xf32> to vector<1xf32>
      %70 = vector.shape_cast %69 : vector<1xf32> to vector<1x1x1xf32>
      %71 = vector.extract %70[0, 0, 0] : f32 from vector<1x1x1xf32>
      %72 = arith.divf %67, %71 : f32
      %c0_29 = arith.constant 0 : index
      %c0_30 = arith.constant 0 : index
      %c0_31 = arith.constant 0 : index
      %73 = vector.load %arg3[%c0_29, %c0_30, %c0_31] : memref<1x8x128xf32, #tpu.memory_space<vmem>>, vector<1x8x128xf32>
      %cst_32 = arith.constant 0.000000e+00 : f32
      %74 = vector.broadcast %72 : f32 to vector<1x8x128xf32>
      %75 = vector.broadcast %cst_32 : f32 to vector<1x8x128xf32>
      %76 = arith.select %49, %74, %75 : vector<1x8x128xi1>, vector<1x8x128xf32>
      %77 = arith.addf %73, %76 : vector<1x8x128xf32>
      %c0_33 = arith.constant 0 : index
      %c0_34 = arith.constant 0 : index
      %c0_35 = arith.constant 0 : index
      %78 = vector.load %arg3[%c0_33, %c0_34, %c0_35] : memref<1x8x128xf32, #tpu.memory_space<vmem>>, vector<1x8x128xf32>
      tpu.vector_store %arg3[%c0_33, %c0_34, %c0_35], %77 {strides = array<i32>} : memref<1x8x128xf32, #tpu.memory_space<vmem>>, vector<1x8x128xf32>,
    } else {
    }
    return
  }
  func.func @transform_0(%arg0: i32) -> (i32, i32, i32) {
    %c0_i32 = arith.constant 0 : i32
    %c0_i32_0 = arith.constant 0 : i32
    %c0_i32_1 = arith.constant 0 : i32
    %c0_i32_2 = arith.constant 0 : i32
    return %c0_i32, %c0_i32_0, %c0_i32_1 : i32, i32, i32
  }
  func.func @transform_1(%arg0: i32) -> (i32, i32) {
    %c0_i32 = arith.constant 0 : i32
    %c0_i32_0 = arith.constant 0 : i32
    return %c0_i32, %arg0 : i32, i32
  }
  func.func @transform_2(%arg0: i32) -> (i32, i32, i32) {
    %c0_i32 = arith.constant 0 : i32
    %c0_i32_0 = arith.constant 0 : i32
    %c0_i32_1 = arith.constant 0 : i32
    return %arg0, %c0_i32, %c0_i32_0 : i32, i32, i32
  }
}

</mosaic_0001>

<bundles_post_ra>
// kernel: tpu_custom_call.1
= control target key start
LH: loop header
LB: loop body
LE: loop exit
PB: predicated region body
PF: predicated region fallthrough
CT: control target
= control target key end

     0   :  { %7 = vsyncpa [#allocation3], 0  ;;  %s3886_s0 = inlined_call_operand.hbm [shape: f32[2,8,128], index: 0, kind: input, shape index: {}]   ;;  %s3887_s1 = inlined_call_operand.hbm [shape: bf16[128,4608], index: 1, kind: input, shape index: {}]   ;;  %s3888_s2 = inlined_call_operand.hbm [shape: f32[1,8,128], index: 2, kind: output, shape index: {}]  }
   0x1   :  { %8 = vsyncpa [#allocation6], 0 }
   0x2   :  { %9 = vsyncpa [#allocation4], 0  ;;  %s3738_s9 = smov [#allocation2]  }
   0x3   :  { %s15_s10 = sshll.u32 %s3738_s9, 4  ;;  %s16_s10 = int_to_ptr.vmem [resolvable:$true] %s15_s10 }
   0x4   :  { %s3680_s11 = scalar_lea.vmem %s16_s10, 256  ;;  %p3685_p1 = scmp.lt.s32.totalorder %s16_s10, %s16_s10 }
   0x5   :  { %p3681_p0 = scmp.ne.s32.totalorder %s16_s10, %s3680_s11  ;;  %p3686_p2 = scmp.lt.s32.totalorder %s3680_s11, %s3680_s11 }
   0x7   :  { %p3687_p3 = por %p3686_p2, %p3685_p1 }
   0x9   :  { %p3688_p4 = pnand %p3687_p3, %p3681_p0 }
   0xb   :  { %3691 = shalt.err (!%p3688_p4)
}
   0xc   :  { %s3739_s12 = smov 128   ;;  %s3740_s13 = smov 8  }
   0xd   :  { %21 = dma.hbm_to_vmem [thread:$0]  %s3886_s0, 256, %s16_s10, [#allocation3], %s3739_s12, %s3739_s12, %s3740_s13  }
   0xe   :  { %s3741_s16 = smov [#allocation5]  }
   0xf   :  { %s27_s17 = sshll.u32 %s3741_s16, 4  ;;  %s28_s17 = int_to_ptr.vmem [resolvable:$true] %s27_s17 }
  0x10   :  { %s3700_s18 = scalar_lea.vmem %s28_s17, 36864  ;;  %p3705_p6 = scmp.lt.s32.totalorder %s28_s17, %s28_s17 }
  0x11   :  { %p3701_p5 = scmp.ne.s32.totalorder %s28_s17, %s3700_s18  ;;  %p3706_p7 = scmp.lt.s32.totalorder %s3700_s18, %s3700_s18 }
  0x13   :  { %p3707_p8 = por %p3706_p7, %p3705_p6 }
  0x15   :  { %p3708_p9 = pnand %p3707_p8, %p3701_p5 }
  0x17   :  { %3711 = shalt.err (!%p3708_p9)
}
  0x18   :  { %s3742_s19 = smov 2304   ;;  %s3743_s20 = smov 144  }
  0x19   :  { %33 = dma.hbm_to_vmem [thread:$0]  %s3887_s1, 36864, %s28_s17, [#allocation6], %s3742_s19, %s3742_s19, %s3743_s20  }
  0x1a   :  { %3732 = dma.done.wait [#allocation3], 256  }
  0x1b   :  { %3733 = vsyncadd [#allocation3], 4294967040 }
  0x1c   :  { %3734 = dma.done.wait [#allocation6], 36864  }
  0x1d   :  { %3735 = vsyncadd [#allocation6], 4294930432  ;;  %v3744_v0 = vmov 0   ;;  %v3253_v1 = vld [vmem:[#allocation5 + $0x7e4] ss:$144 sps:$4 sm:$0xff]   ;;  %v43_v30 = vld [vmem:[#allocation2 + $0x8] sm:$0xff] }
  0x1e   :  { %526 = vmatprep.mubr.bf16.mxu0 %v3744_v0  ;;  %567 = vmatprep.mubr.bf16.mxu1 %v3744_v0  ;;  %v3255_v2 = vld [vmem:[#allocation5 + $0x7ec] ss:$144 sps:$4 sm:$0xff]   ;;  %v3257_v3 = vld [vmem:[#allocation5 + $0x7e0] ss:$144 sps:$4 sm:$0xff]   ;;  %v3258_v4 = vld [vmem:[#allocation5 + $0x7e8] ss:$144 sps:$4 sm:$0xff]  }
  0x1f   :  { %494 = vmatprep.subr.bf16.mxu0 %v3253_v1  ;;  %535 = vmatprep.subr.bf16.mxu1 %v3255_v2  ;;  %v3259_v5 = vld [vmem:[#allocation5 + $0x6c4] ss:$144 sps:$4 sm:$0xff]   ;;  %v3261_v6 = vld [vmem:[#allocation5 + $0x6cc] ss:$144 sps:$4 sm:$0xff]   ;;  %v3263_v7 = vld [vmem:[#allocation5 + $0x6c0] ss:$144 sps:$4 sm:$0xff]  }
  0x20   :  { %495 = vmatpush1.bf16.msra.mxu0 %v3257_v3  ;;  %536 = vmatpush1.bf16.msra.mxu1 %v3258_v4  ;;  %v3264_v8 = vld [vmem:[#allocation5 + $0x6c8] ss:$144 sps:$4 sm:$0xff]   ;;  %v3265_v9 = vld [vmem:[#allocation5 + $0x5a4] ss:$144 sps:$4 sm:$0xff]   ;;  %v3267_v10 = vld [vmem:[#allocation5 + $0x5ac] ss:$144 sps:$4 sm:$0xff]  }
  0x21   :  { %496 = vmatprep.subr.bf16.mxu0 %v3259_v5  ;;  %537 = vmatprep.subr.bf16.mxu1 %v3261_v6  ;;  %v3269_v11 = vld [vmem:[#allocation5 + $0x5a0] ss:$144 sps:$4 sm:$0xff]   ;;  %v3270_v12 = vld [vmem:[#allocation5 + $0x5a8] ss:$144 sps:$4 sm:$0xff]   ;;  %v3271_v13 = vld [vmem:[#allocation5 + $0x484] ss:$144 sps:$4 sm:$0xff]  }
  0x22   :  { %v3273_v14 = vld [vmem:[#allocation5 + $0x48c] ss:$144 sps:$4 sm:$0xff]   ;;  %v3275_v15 = vld [vmem:[#allocation5 + $0x480] ss:$144 sps:$4 sm:$0xff]   ;;  %v3276_v16 = vld [vmem:[#allocation5 + $0x488] ss:$144 sps:$4 sm:$0xff]  }
  0x23   :  { %v3277_v17 = vld [vmem:[#allocation5 + $0x364] ss:$144 sps:$4 sm:$0xff]   ;;  %v3279_v18 = vld [vmem:[#allocation5 + $0x36c] ss:$144 sps:$4 sm:$0xff]   ;;  %v3281_v19 = vld [vmem:[#allocation5 + $0x360] ss:$144 sps:$4 sm:$0xff]  }
  0x24   :  { %497 = vmatpush1.bf16.msra.mxu0 %v3263_v7  ;;  %538 = vmatpush1.bf16.msra.mxu1 %v3264_v8  ;;  %v3282_v20 = vld [vmem:[#allocation5 + $0x368] ss:$144 sps:$4 sm:$0xff]   ;;  %v3283_v21 = vld [vmem:[#allocation5 + $0x244] ss:$144 sps:$4 sm:$0xff]   ;;  %v3285_v22 = vld [vmem:[#allocation5 + $0x24c] ss:$144 sps:$4 sm:$0xff]  }
  0x25   :  { %498 = vmatprep.subr.bf16.mxu0 %v3265_v9  ;;  %539 = vmatprep.subr.bf16.mxu1 %v3267_v10  ;;  %v3287_v23 = vld [vmem:[#allocation5 + $0x240] ss:$144 sps:$4 sm:$0xff]   ;;  %v3288_v24 = vld [vmem:[#allocation5 + $0x248] ss:$144 sps:$4 sm:$0xff]   ;;  %v3289_v25 = vld [vmem:[#allocation5 + $0x124] ss:$144 sps:$4 sm:$0xff]  }
  0x26   :  { %v3291_v26 = vld [vmem:[#allocation5 + $0x12c] ss:$144 sps:$4 sm:$0xff]   ;;  %v3293_v27 = vld [vmem:[#allocation5 + $0x120] ss:$144 sps:$4 sm:$0xff]   ;;  %v3294_v28 = vld [vmem:[#allocation5 + $0x128] ss:$144 sps:$4 sm:$0xff]  }
  0x27   :  { %v41_v29 = vld [vmem:[#allocation2] sm:$0xff]  ;;  %v3297_v32 = vld [vmem:[#allocation5 + $0xc] ss:$144 sps:$4 sm:$0xff]   ;;  %v3300_v35 = vld [vmem:[#allocation5 + $0x8] ss:$144 sps:$4 sm:$0xff]   ;;  %v3745_v9 = vmov 0.0  }
  0x28   :  { %499 = vmatpush1.bf16.msra.mxu0 %v3269_v11  ;;  %540 = vmatpush1.bf16.msra.mxu1 %v3270_v12  ;;  %v3295_v31 = vld [vmem:[#allocation5 + $0x4] ss:$144 sps:$4 sm:$0xff]   ;;  %v3771_v33 = vsub.f32 %v41_v29, %v43_v30  ;;  %v3299_v34 = vld [vmem:[#allocation5] ss:$144 sps:$4 sm:$0xff]   ;;  %v3306_v37 = vld [vmem:[#allocation5 + $0x7fc] ss:$144 sps:$4 sm:$0xff]  }
  0x29   :  { %500 = vmatprep.subr.bf16.mxu0 %v3271_v13  ;;  %541 = vmatprep.subr.bf16.mxu1 %v3273_v14  ;;  %v3303_v36 = vld [vmem:[#allocation5 + $0x7f4] ss:$144 sps:$4 sm:$0xff]   ;;  %v3301_v39 = vld [vmem:[#allocation5 + $0x7f0] ss:$144 sps:$4 sm:$0xff]   ;;  %v3304_v40 = vld [vmem:[#allocation5 + $0x7f8] ss:$144 sps:$4 sm:$0xff]  }
  0x2a   :  { %v3775_v38 = vpack.c.bf16 %v3771_v33, %v3771_v33  ;;  %v3309_v41 = vld [vmem:[#allocation5 + $0x6d4] ss:$144 sps:$4 sm:$0xff]   ;;  %v3312_v42 = vld [vmem:[#allocation5 + $0x6dc] ss:$144 sps:$4 sm:$0xff]   ;;  %v3307_v43 = vld [vmem:[#allocation5 + $0x6d0] ss:$144 sps:$4 sm:$0xff]  }
  0x2b   :  { %v3310_v44 = vld [vmem:[#allocation5 + $0x6d8] ss:$144 sps:$4 sm:$0xff]   ;;  %v3315_v45 = vld [vmem:[#allocation5 + $0x5b4] ss:$144 sps:$4 sm:$0xff]   ;;  %v3318_v46 = vld [vmem:[#allocation5 + $0x5bc] ss:$144 sps:$4 sm:$0xff]  }
  0x2c   :  { %501 = vmatpush1.bf16.msra.mxu0 %v3275_v15  ;;  %542 = vmatpush1.bf16.msra.mxu1 %v3276_v16  ;;  %v3313_v47 = vld [vmem:[#allocation5 + $0x5b0] ss:$144 sps:$4 sm:$0xff]   ;;  %v3316_v48 = vld [vmem:[#allocation5 + $0x5b8] ss:$144 sps:$4 sm:$0xff]   ;;  %v3321_v49 = vld [vmem:[#allocation5 + $0x494] ss:$144 sps:$4 sm:$0xff]  }
  0x2d   :  { %502 = vmatprep.subr.bf16.mxu0 %v3277_v17  ;;  %543 = vmatprep.subr.bf16.mxu1 %v3279_v18  ;;  %v3324_v50 = vld [vmem:[#allocation5 + $0x49c] ss:$144 sps:$4 sm:$0xff]   ;;  %v3319_v51 = vld [vmem:[#allocation5 + $0x490] ss:$144 sps:$4 sm:$0xff]   ;;  %v3322_v52 = vld [vmem:[#allocation5 + $0x498] ss:$144 sps:$4 sm:$0xff]  }
  0x2e   :  { %v3327_v53 = vld [vmem:[#allocation5 + $0x374] ss:$144 sps:$4 sm:$0xff]   ;;  %v3330_v54 = vld [vmem:[#allocation5 + $0x37c] ss:$144 sps:$4 sm:$0xff]   ;;  %v3325_v55 = vld [vmem:[#allocation5 + $0x370] ss:$144 sps:$4 sm:$0xff]  }
  0x2f   :  { %v3328_v56 = vld [vmem:[#allocation5 + $0x378] ss:$144 sps:$4 sm:$0xff]   ;;  %v3333_v57 = vld [vmem:[#allocation5 + $0x254] ss:$144 sps:$4 sm:$0xff]   ;;  %v3336_v58 = vld [vmem:[#allocation5 + $0x25c] ss:$144 sps:$4 sm:$0xff]  }
  0x30   :  { %503 = vmatpush1.bf16.msra.mxu0 %v3281_v19  ;;  %544 = vmatpush1.bf16.msra.mxu1 %v3282_v20  ;;  %v3331_v59 = vld [vmem:[#allocation5 + $0x250] ss:$144 sps:$4 sm:$0xff]   ;;  %v3334_v60 = vld [vmem:[#allocation5 + $0x258] ss:$144 sps:$4 sm:$0xff]   ;;  %v3339_v61 = vld [vmem:[#allocation5 + $0x134] ss:$144 sps:$4 sm:$0xff]  }
  0x31   :  { %504 = vmatprep.subr.bf16.mxu0 %v3283_v21  ;;  %545 = vmatprep.subr.bf16.mxu1 %v3285_v22  ;;  %v3342_v62 = vld [vmem:[#allocation5 + $0x13c] ss:$144 sps:$4 sm:$0xff]   ;;  %v3337_v63 = vld [vmem:[#allocation5 + $0x130] ss:$144 sps:$4 sm:$0xff]   ;;  %v3340_v1 = vld [vmem:[#allocation5 + $0x138] ss:$144 sps:$4 sm:$0xff]  }
  0x32   :  { %v3345_v2 = vld [vmem:[#allocation5 + $0x14] ss:$144 sps:$4 sm:$0xff]   ;;  %v3348_v3 = vld [vmem:[#allocation5 + $0x1c] ss:$144 sps:$4 sm:$0xff]   ;;  %v3343_v4 = vld [vmem:[#allocation5 + $0x10] ss:$144 sps:$4 sm:$0xff]  }
  0x33   :  { %v3346_v5 = vld [vmem:[#allocation5 + $0x18] ss:$144 sps:$4 sm:$0xff]   ;;  %v3349_v7 = vld [vmem:[#allocation5 + $0x804] ss:$144 sps:$4 sm:$0xff]   ;;  %v3352_v8 = vld [vmem:[#allocation5 + $0x800] ss:$144 sps:$4 sm:$0xff]  }
  0x34   :  { %505 = vmatpush1.bf16.msra.mxu0 %v3287_v23  ;;  %546 = vmatpush1.bf16.msra.mxu1 %v3288_v24  ;;  %v3351_v6 = vld [vmem:[#allocation5 + $0x808] ss:$144 sps:$4 sm:$0xff]   ;;  %v3353_v11 = vld [vmem:[#allocation5 + $0x6e4] ss:$144 sps:$4 sm:$0xff]   ;;  %v3356_v12 = vld [vmem:[#allocation5 + $0x6e0] ss:$144 sps:$4 sm:$0xff]  }
  0x35   :  { %506 = vmatprep.subr.bf16.mxu0 %v3289_v25  ;;  %547 = vmatprep.subr.bf16.mxu1 %v3291_v26  ;;  %v3355_v10 = vld [vmem:[#allocation5 + $0x6e8] ss:$144 sps:$4 sm:$0xff]   ;;  %vm3746_vm0 = vmmov 0   ;;  %v3357_v14 = vld [vmem:[#allocation5 + $0x5c4] ss:$144 sps:$4 sm:$0xff]   ;;  %s3747_s4 = smov [#allocation7]  }
  0x36   :  { %v3359_v13 = vld [vmem:[#allocation5 + $0x5c8] ss:$144 sps:$4 sm:$0xff]   ;;  %v3360_v15 = vld [vmem:[#allocation5 + $0x5c0] ss:$144 sps:$4 sm:$0xff]   ;;  %v3361_v17 = vld [vmem:[#allocation5 + $0x4a4] ss:$144 sps:$4 sm:$0xff]  }
  0x37   :  { %v3363_v16 = vld [vmem:[#allocation5 + $0x4a8] ss:$144 sps:$4 sm:$0xff]   ;;  %v3364_v18 = vld [vmem:[#allocation5 + $0x4a0] ss:$144 sps:$4 sm:$0xff]   ;;  %v3365_v20 = vld [vmem:[#allocation5 + $0x384] ss:$144 sps:$4 sm:$0xff]  }
  0x38   :  { %507 = vmatpush1.bf16.msra.mxu0 %v3293_v27  ;;  %548 = vmatpush1.bf16.msra.mxu1 %v3294_v28  ;;  %v3367_v19 = vld [vmem:[#allocation5 + $0x388] ss:$144 sps:$4 sm:$0xff]   ;;  %v3368_v21 = vld [vmem:[#allocation5 + $0x380] ss:$144 sps:$4 sm:$0xff]   ;;  %v3369_v23 = vld [vmem:[#allocation5 + $0x264] ss:$144 sps:$4 sm:$0xff]  }
  0x39   :  { %508 = vmatprep.subr.bf16.mxu0 %v3295_v31  ;;  %549 = vmatprep.subr.bf16.mxu1 %v3297_v32  ;;  %v3371_v22 = vld [vmem:[#allocation5 + $0x268] ss:$144 sps:$4 sm:$0xff]   ;;  %v3372_v24 = vld [vmem:[#allocation5 + $0x260] ss:$144 sps:$4 sm:$0xff]   ;;  %v3373_v26 = vld [vmem:[#allocation5 + $0x144] ss:$144 sps:$4 sm:$0xff]  }
  0x3a   :  { %v3375_v25 = vld [vmem:[#allocation5 + $0x148] ss:$144 sps:$4 sm:$0xff]   ;;  %v3376_v27 = vld [vmem:[#allocation5 + $0x140] ss:$144 sps:$4 sm:$0xff]   ;;  %v3377_v29 = vld [vmem:[#allocation5 + $0x24] ss:$144 sps:$4 sm:$0xff]  }
  0x3b   :  { %v3379_v28 = vld [vmem:[#allocation5 + $0x28] ss:$144 sps:$4 sm:$0xff]   ;;  %v3380_v30 = vld [vmem:[#allocation5 + $0x20] ss:$144 sps:$4 sm:$0xff]   ;;  %s2815_s5 = sshll.u32 %s3747_s4, 4  ;;  %s2816_s5 = int_to_ptr.vmem [resolvable:$true] %s2815_s5 }
  0x3c   :  { %509 = vmatpush1.bf16.msra.mxu0 %v3299_v34  ;;  %550 = vmatpush1.bf16.msra.mxu1 %v3300_v35  ;;  %v3383_v31 = vld [vmem:[#allocation5 + $0x810] ss:$144 sps:$4 sm:$0xff]   ;;  %v3386_v32 = vld [vmem:[#allocation5 + $0x818] ss:$144 sps:$4 sm:$0xff]   ;;  %v3381_v34 = vld [vmem:[#allocation5 + $0x80c] ss:$144 sps:$4 sm:$0xff]   ;;  %p3717_p11 = scmp.lt.s32.totalorder %s2816_s5, %s2816_s5 }
  0x3d   :  { %576 = vmatprep.subr.bf16.mxu0 %v3303_v36  ;;  %617 = vmatprep.subr.bf16.mxu1 %v3306_v37  ;;  %v3384_v35 = vld [vmem:[#allocation5 + $0x814] ss:$144 sps:$4 sm:$0xff]   ;;  %v3389_v36 = vld [vmem:[#allocation5 + $0x6f0] ss:$144 sps:$4 sm:$0xff]   ;;  %v3392_v37 = vld [vmem:[#allocation5 + $0x6f8] ss:$144 sps:$4 sm:$0xff]  }
  0x3e   :  { %s3712_s6 = scalar_lea.vmem %s2816_s5, 128 }
  0x3f   :  { %527 = vmatmul.mubr.bf16.vlgmr.msra.gmra.mxu0 %v3775_v38  ;;  %568 = vmatmul.mubr.bf16.vlgmr.msra.gmra.mxu1 %v3775_v38  ;;  %p3713_p10 = scmp.ne.s32.totalorder %s2816_s5, %s3712_s6  ;;  %p3718_p12 = scmp.lt.s32.totalorder %s3712_s6, %s3712_s6 }
  0x40   :  { %577 = vmatpush1.bf16.msra.mxu0 %v3301_v39  ;;  %618 = vmatpush1.bf16.msra.mxu1 %v3304_v40  ;;  %v3387_v39 = vld [vmem:[#allocation5 + $0x6ec] ss:$144 sps:$4 sm:$0xff]   ;;  %v3390_v40 = vld [vmem:[#allocation5 + $0x6f4] ss:$144 sps:$4 sm:$0xff]  }
  0x41   :  { %578 = vmatprep.subr.bf16.mxu0 %v3309_v41  ;;  %619 = vmatprep.subr.bf16.mxu1 %v3312_v42  ;;  %v3395_v41 = vld [vmem:[#allocation5 + $0x5d0] ss:$144 sps:$4 sm:$0xff]   ;;  %v3398_v42 = vld [vmem:[#allocation5 + $0x5d8] ss:$144 sps:$4 sm:$0xff]   ;;  %p3719_p13 = por %p3718_p12, %p3717_p11 }
  0x42   :  { %608 = vmatprep.mubr.bf16.mxu0 %v3744_v0  ;;  %649 = vmatprep.mubr.bf16.mxu1 %v3744_v0 }
  0x43   :  { %p3720_p0 = pnand %p3719_p13, %p3713_p10 }
  0x44   :  { %579 = vmatpush1.bf16.msra.mxu0 %v3307_v43  ;;  %620 = vmatpush1.bf16.msra.mxu1 %v3310_v44  ;;  %v3393_v43 = vld [vmem:[#allocation5 + $0x5cc] ss:$144 sps:$4 sm:$0xff]   ;;  %v3396_v44 = vld [vmem:[#allocation5 + $0x5d4] ss:$144 sps:$4 sm:$0xff]  }
  0x45   :  { %580 = vmatprep.subr.bf16.mxu0 %v3315_v45  ;;  %621 = vmatprep.subr.bf16.mxu1 %v3318_v46  ;;  %v3401_v45 = vld [vmem:[#allocation5 + $0x4b0] ss:$144 sps:$4 sm:$0xff]   ;;  %v3404_v46 = vld [vmem:[#allocation5 + $0x4b8] ss:$144 sps:$4 sm:$0xff]  }
  0x48   :  { %581 = vmatpush1.bf16.msra.mxu0 %v3313_v47  ;;  %622 = vmatpush1.bf16.msra.mxu1 %v3316_v48  ;;  %v3399_v47 = vld [vmem:[#allocation5 + $0x4ac] ss:$144 sps:$4 sm:$0xff]   ;;  %v3402_v48 = vld [vmem:[#allocation5 + $0x4b4] ss:$144 sps:$4 sm:$0xff]  }
  0x49   :  { %582 = vmatprep.subr.bf16.mxu0 %v3321_v49  ;;  %623 = vmatprep.subr.bf16.mxu1 %v3324_v50  ;;  %v3407_v49 = vld [vmem:[#allocation5 + $0x390] ss:$144 sps:$4 sm:$0xff]   ;;  %v3410_v50 = vld [vmem:[#allocation5 + $0x398] ss:$144 sps:$4 sm:$0xff]  }
  0x4c   :  { %583 = vmatpush1.bf16.msra.mxu0 %v3319_v51  ;;  %624 = vmatpush1.bf16.msra.mxu1 %v3322_v52  ;;  %v3405_v51 = vld [vmem:[#allocation5 + $0x38c] ss:$144 sps:$4 sm:$0xff]   ;;  %v3408_v52 = vld [vmem:[#allocation5 + $0x394] ss:$144 sps:$4 sm:$0xff]  }
  0x4d   :  { %584 = vmatprep.subr.bf16.mxu0 %v3327_v53  ;;  %625 = vmatprep.subr.bf16.mxu1 %v3330_v54  ;;  %v3413_v53 = vld [vmem:[#allocation5 + $0x270] ss:$144 sps:$4 sm:$0xff]   ;;  %v3416_v54 = vld [vmem:[#allocation5 + $0x278] ss:$144 sps:$4 sm:$0xff]  }
  0x50   :  { %585 = vmatpush1.bf16.msra.mxu0 %v3325_v55  ;;  %626 = vmatpush1.bf16.msra.mxu1 %v3328_v56  ;;  %v3411_v55 = vld [vmem:[#allocation5 + $0x26c] ss:$144 sps:$4 sm:$0xff]   ;;  %v3414_v56 = vld [vmem:[#allocation5 + $0x274] ss:$144 sps:$4 sm:$0xff]  }
  0x51   :  { %586 = vmatprep.subr.bf16.mxu0 %v3333_v57  ;;  %627 = vmatprep.subr.bf16.mxu1 %v3336_v58  ;;  %v3419_v57 = vld [vmem:[#allocation5 + $0x150] ss:$144 sps:$4 sm:$0xff]   ;;  %v3422_v58 = vld [vmem:[#allocation5 + $0x158] ss:$144 sps:$4 sm:$0xff]  }
  0x54   :  { %587 = vmatpush1.bf16.msra.mxu0 %v3331_v59  ;;  %628 = vmatpush1.bf16.msra.mxu1 %v3334_v60  ;;  %v3417_v59 = vld [vmem:[#allocation5 + $0x14c] ss:$144 sps:$4 sm:$0xff]   ;;  %v3420_v60 = vld [vmem:[#allocation5 + $0x154] ss:$144 sps:$4 sm:$0xff]  }
  0x55   :  { %588 = vmatprep.subr.bf16.mxu0 %v3339_v61  ;;  %629 = vmatprep.subr.bf16.mxu1 %v3342_v62  ;;  %v3425_v61 = vld [vmem:[#allocation5 + $0x30] ss:$144 sps:$4 sm:$0xff]   ;;  %v3428_v62 = vld [vmem:[#allocation5 + $0x38] ss:$144 sps:$4 sm:$0xff]  }
  0x58   :  { %589 = vmatpush1.bf16.msra.mxu0 %v3337_v63  ;;  %630 = vmatpush1.bf16.msra.mxu1 %v3340_v1  ;;  %v3423_v63 = vld [vmem:[#allocation5 + $0x2c] ss:$144 sps:$4 sm:$0xff]   ;;  %v3426_v1 = vld [vmem:[#allocation5 + $0x34] ss:$144 sps:$4 sm:$0xff]  }
  0x59   :  { %590 = vmatprep.subr.bf16.mxu0 %v3345_v2  ;;  %631 = vmatprep.subr.bf16.mxu1 %v3348_v3  ;;  %v3431_v2 = vld [vmem:[#allocation5 + $0x820] ss:$144 sps:$4 sm:$0xff]   ;;  %v3429_v3 = vld [vmem:[#allocation5 + $0x81c] ss:$144 sps:$4 sm:$0xff]  }
  0x5c   :  { %591 = vmatpush1.bf16.msra.mxu0 %v3343_v4  ;;  %632 = vmatpush1.bf16.msra.mxu1 %v3346_v5  ;;  %v3432_v4 = vld [vmem:[#allocation5 + $0x824] ss:$144 sps:$4 sm:$0xff]   ;;  %v3435_v5 = vld [vmem:[#allocation5 + $0x700] ss:$144 sps:$4 sm:$0xff]  }
  0x5d   :  { %3149 = vmatprep.subr.bf16.mxu0 %v3745_v9  ;;  %1173 = vmatprep.subr.bf16.mxu1 %v3351_v6  ;;  %v3433_v6 = vld [vmem:[#allocation5 + $0x6fc] ss:$144 sps:$4 sm:$0xff]  }
  0x5f   :  { %609 = vmatmul.mubr.bf16.vlgmr.msra.gmra.mxu0 %v3775_v38  ;;  %650 = vmatmul.mubr.bf16.vlgmr.msra.gmra.mxu1 %v3775_v38 }
  0x60   :  { %3150 = vmatpush3.bf16.msra.mxu0 %v3352_v8  ;;  %1174 = vmatpush1.bf16.msra.mxu1 %v3349_v7  ;;  %v3436_v7 = vld [vmem:[#allocation5 + $0x704] ss:$144 sps:$4 sm:$0xff]   ;;  %v3439_v8 = vld [vmem:[#allocation5 + $0x5e0] ss:$144 sps:$4 sm:$0xff]  }
  0x61   :  { %3151 = vmatprep.subr.bf16.mxu0 %v3745_v9  ;;  %1175 = vmatprep.subr.bf16.mxu1 %v3355_v10  ;;  %v3437_v10 = vld [vmem:[#allocation5 + $0x5dc] ss:$144 sps:$4 sm:$0xff]  }
  0x62   :  { %3165 = vmatprep.mubr.msk.bf16.mxu0 %vm3746_vm0, %v3745_v9  ;;  %1205 = vmatprep.mubr.bf16.mxu1 %v3744_v0 }
  0x64   :  { %3152 = vmatpush3.bf16.msra.mxu0 %v3356_v12  ;;  %1176 = vmatpush1.bf16.msra.mxu1 %v3353_v11  ;;  %v3440_v11 = vld [vmem:[#allocation5 + $0x5e4] ss:$144 sps:$4 sm:$0xff]   ;;  %v3443_v12 = vld [vmem:[#allocation5 + $0x4c0] ss:$144 sps:$4 sm:$0xff]  }
  0x65   :  { %3153 = vmatprep.subr.bf16.mxu0 %v3745_v9  ;;  %1177 = vmatprep.subr.bf16.mxu1 %v3359_v13  ;;  %v3441_v13 = vld [vmem:[#allocation5 + $0x4bc] ss:$144 sps:$4 sm:$0xff]  }
  0x68   :  { %3154 = vmatpush3.bf16.msra.mxu0 %v3360_v15  ;;  %1178 = vmatpush1.bf16.msra.mxu1 %v3357_v14  ;;  %v3444_v14 = vld [vmem:[#allocation5 + $0x4c4] ss:$144 sps:$4 sm:$0xff]   ;;  %v3447_v15 = vld [vmem:[#allocation5 + $0x3a0] ss:$144 sps:$4 sm:$0xff]  }
  0x69   :  { %3155 = vmatprep.subr.bf16.mxu0 %v3745_v9  ;;  %1179 = vmatprep.subr.bf16.mxu1 %v3363_v16  ;;  %v3445_v16 = vld [vmem:[#allocation5 + $0x39c] ss:$144 sps:$4 sm:$0xff]  }
  0x6c   :  { %3156 = vmatpush3.bf16.msra.mxu0 %v3364_v18  ;;  %1180 = vmatpush1.bf16.msra.mxu1 %v3361_v17  ;;  %v3448_v17 = vld [vmem:[#allocation5 + $0x3a4] ss:$144 sps:$4 sm:$0xff]   ;;  %v3451_v18 = vld [vmem:[#allocation5 + $0x280] ss:$144 sps:$4 sm:$0xff]  }
  0x6d   :  { %3157 = vmatprep.subr.bf16.mxu0 %v3745_v9  ;;  %1181 = vmatprep.subr.bf16.mxu1 %v3367_v19  ;;  %v3449_v19 = vld [vmem:[#allocation5 + $0x27c] ss:$144 sps:$4 sm:$0xff]  }
  0x70   :  { %3158 = vmatpush3.bf16.msra.mxu0 %v3368_v21  ;;  %1182 = vmatpush1.bf16.msra.mxu1 %v3365_v20  ;;  %v3452_v20 = vld [vmem:[#allocation5 + $0x284] ss:$144 sps:$4 sm:$0xff]   ;;  %v3455_v21 = vld [vmem:[#allocation5 + $0x160] ss:$144 sps:$4 sm:$0xff]  }
  0x71   :  { %3159 = vmatprep.subr.bf16.mxu0 %v3745_v9  ;;  %1183 = vmatprep.subr.bf16.mxu1 %v3371_v22  ;;  %v3453_v22 = vld [vmem:[#allocation5 + $0x15c] ss:$144 sps:$4 sm:$0xff]  }
  0x74   :  { %3160 = vmatpush3.bf16.msra.mxu0 %v3372_v24  ;;  %1184 = vmatpush1.bf16.msra.mxu1 %v3369_v23  ;;  %v3456_v23 = vld [vmem:[#allocation5 + $0x164] ss:$144 sps:$4 sm:$0xff]   ;;  %v3459_v24 = vld [vmem:[#allocation5 + $0x40] ss:$144 sps:$4 sm:$0xff]  }
  0x75   :  { %3161 = vmatprep.subr.bf16.mxu0 %v3745_v9  ;;  %1185 = vmatprep.subr.bf16.mxu1 %v3375_v25  ;;  %v3457_v25 = vld [vmem:[#allocation5 + $0x3c] ss:$144 sps:$4 sm:$0xff]  }
  0x78   :  { %3162 = vmatpush3.bf16.msra.mxu0 %v3376_v27  ;;  %1186 = vmatpush1.bf16.msra.mxu1 %v3373_v26  ;;  %v3460_v26 = vld [vmem:[#allocation5 + $0x44] ss:$144 sps:$4 sm:$0xff]   ;;  %v3463_v27 = vld [vmem:[#allocation5 + $0x82c] ss:$144 sps:$4 sm:$0xff]  }
  0x79   :  { %3163 = vmatprep.subr.bf16.mxu0 %v3745_v9  ;;  %1187 = vmatprep.subr.bf16.mxu1 %v3379_v28  ;;  %v3466_v28 = vld [vmem:[#allocation5 + $0x834] ss:$144 sps:$4 sm:$0xff]  }
  0x7c   :  { %3164 = vmatpush3.bf16.msra.mxu0 %v3380_v30  ;;  %1188 = vmatpush1.bf16.msra.mxu1 %v3377_v29  ;;  %v3461_v29 = vld [vmem:[#allocation5 + $0x828] ss:$144 sps:$4 sm:$0xff]   ;;  %v3464_v30 = vld [vmem:[#allocation5 + $0x830] ss:$144 sps:$4 sm:$0xff]  }
  0x7d   :  { %1214 = vmatprep.subr.bf16.mxu0 %v3383_v31  ;;  %1255 = vmatprep.subr.bf16.mxu1 %v3386_v32  ;;  %v3469_v31 = vld [vmem:[#allocation5 + $0x70c] ss:$144 sps:$4 sm:$0xff]   ;;  %v3472_v32 = vld [vmem:[#allocation5 + $0x714] ss:$144 sps:$4 sm:$0xff]  }
  0x7f   :  { %3166 = vmatmul.mubr.bf16.vlgmr.msra.gmra.mxu0 %v3775_v38  ;;  %1206 = vmatmul.mubr.bf16.vlgmr.msra.gmra.mxu1 %v3775_v38 }
  0x80   :  { %1215 = vmatpush1.bf16.msra.mxu0 %v3381_v34  ;;  %1256 = vmatpush1.bf16.msra.mxu1 %v3384_v35  ;;  %v3467_v34 = vld [vmem:[#allocation5 + $0x708] ss:$144 sps:$4 sm:$0xff]   ;;  %v3470_v35 = vld [vmem:[#allocation5 + $0x710] ss:$144 sps:$4 sm:$0xff]  }
  0x81   :  { %1216 = vmatprep.subr.bf16.mxu0 %v3389_v36  ;;  %1257 = vmatprep.subr.bf16.mxu1 %v3392_v37  ;;  %v3475_v36 = vld [vmem:[#allocation5 + $0x5ec] ss:$144 sps:$4 sm:$0xff]   ;;  %v3478_v37 = vld [vmem:[#allocation5 + $0x5f4] ss:$144 sps:$4 sm:$0xff]  }
  0x82   :  { %1246 = vmatprep.mubr.bf16.mxu0 %v3744_v0  ;;  %1287 = vmatprep.mubr.bf16.mxu1 %v3744_v0 }
  0x84   :  { %1217 = vmatpush1.bf16.msra.mxu0 %v3387_v39  ;;  %1258 = vmatpush1.bf16.msra.mxu1 %v3390_v40  ;;  %v3473_v39 = vld [vmem:[#allocation5 + $0x5e8] ss:$144 sps:$4 sm:$0xff]   ;;  %v3476_v40 = vld [vmem:[#allocation5 + $0x5f0] ss:$144 sps:$4 sm:$0xff]  }
  0x85   :  { %1218 = vmatprep.subr.bf16.mxu0 %v3395_v41  ;;  %1259 = vmatprep.subr.bf16.mxu1 %v3398_v42  ;;  %v3481_v41 = vld [vmem:[#allocation5 + $0x4cc] ss:$144 sps:$4 sm:$0xff]   ;;  %v3484_v42 = vld [vmem:[#allocation5 + $0x4d4] ss:$144 sps:$4 sm:$0xff]  }
  0x88   :  { %1219 = vmatpush1.bf16.msra.mxu0 %v3393_v43  ;;  %1260 = vmatpush1.bf16.msra.mxu1 %v3396_v44  ;;  %v3479_v43 = vld [vmem:[#allocation5 + $0x4c8] ss:$144 sps:$4 sm:$0xff]   ;;  %v3482_v44 = vld [vmem:[#allocation5 + $0x4d0] ss:$144 sps:$4 sm:$0xff]  }
  0x89   :  { %1220 = vmatprep.subr.bf16.mxu0 %v3401_v45  ;;  %1261 = vmatprep.subr.bf16.mxu1 %v3404_v46  ;;  %v3487_v45 = vld [vmem:[#allocation5 + $0x3ac] ss:$144 sps:$4 sm:$0xff]   ;;  %v3490_v46 = vld [vmem:[#allocation5 + $0x3b4] ss:$144 sps:$4 sm:$0xff]  }
  0x8c   :  { %1221 = vmatpush1.bf16.msra.mxu0 %v3399_v47  ;;  %1262 = vmatpush1.bf16.msra.mxu1 %v3402_v48  ;;  %v3485_v47 = vld [vmem:[#allocation5 + $0x3a8] ss:$144 sps:$4 sm:$0xff]   ;;  %v3488_v48 = vld [vmem:[#allocation5 + $0x3b0] ss:$144 sps:$4 sm:$0xff]  }
  0x8d   :  { %1222 = vmatprep.subr.bf16.mxu0 %v3407_v49  ;;  %1263 = vmatprep.subr.bf16.mxu1 %v3410_v50  ;;  %v3493_v49 = vld [vmem:[#allocation5 + $0x28c] ss:$144 sps:$4 sm:$0xff]   ;;  %v3496_v50 = vld [vmem:[#allocation5 + $0x294] ss:$144 sps:$4 sm:$0xff]  }
  0x90   :  { %1223 = vmatpush1.bf16.msra.mxu0 %v3405_v51  ;;  %1264 = vmatpush1.bf16.msra.mxu1 %v3408_v52  ;;  %v3491_v51 = vld [vmem:[#allocation5 + $0x288] ss:$144 sps:$4 sm:$0xff]   ;;  %v3494_v52 = vld [vmem:[#allocation5 + $0x290] ss:$144 sps:$4 sm:$0xff]  }
  0x91   :  { %1224 = vmatprep.subr.bf16.mxu0 %v3413_v53  ;;  %1265 = vmatprep.subr.bf16.mxu1 %v3416_v54  ;;  %v3499_v53 = vld [vmem:[#allocation5 + $0x16c] ss:$144 sps:$4 sm:$0xff]   ;;  %v3502_v54 = vld [vmem:[#allocation5 + $0x174] ss:$144 sps:$4 sm:$0xff]  }
  0x94   :  { %1225 = vmatpush1.bf16.msra.mxu0 %v3411_v55  ;;  %1266 = vmatpush1.bf16.msra.mxu1 %v3414_v56  ;;  %v3497_v55 = vld [vmem:[#allocation5 + $0x168] ss:$144 sps:$4 sm:$0xff]   ;;  %v3500_v56 = vld [vmem:[#allocation5 + $0x170] ss:$144 sps:$4 sm:$0xff]  }
  0x95   :  { %1226 = vmatprep.subr.bf16.mxu0 %v3419_v57  ;;  %1267 = vmatprep.subr.bf16.mxu1 %v3422_v58  ;;  %v3505_v57 = vld [vmem:[#allocation5 + $0x4c] ss:$144 sps:$4 sm:$0xff]   ;;  %v3508_v58 = vld [vmem:[#allocation5 + $0x54] ss:$144 sps:$4 sm:$0xff]  }
  0x98   :  { %1227 = vmatpush1.bf16.msra.mxu0 %v3417_v59  ;;  %1268 = vmatpush1.bf16.msra.mxu1 %v3420_v60  ;;  %v3503_v59 = vld [vmem:[#allocation5 + $0x48] ss:$144 sps:$4 sm:$0xff]   ;;  %v3506_v60 = vld [vmem:[#allocation5 + $0x50] ss:$144 sps:$4 sm:$0xff]  }
  0x99   :  { %1228 = vmatprep.subr.bf16.mxu0 %v3425_v61  ;;  %1269 = vmatprep.subr.bf16.mxu1 %v3428_v62  ;;  %v3511_v61 = vld [vmem:[#allocation5 + $0x83c] ss:$144 sps:$4 sm:$0xff]   ;;  %v3514_v62 = vld [vmem:[#allocation5 + $0x844] ss:$144 sps:$4 sm:$0xff]  }
  0x9c   :  { %1229 = vmatpush1.bf16.msra.mxu0 %v3423_v63  ;;  %1270 = vmatpush1.bf16.msra.mxu1 %v3426_v1  ;;  %v3509_v63 = vld [vmem:[#allocation5 + $0x838] ss:$144 sps:$4 sm:$0xff]   ;;  %v3512_v1 = vld [vmem:[#allocation5 + $0x840] ss:$144 sps:$4 sm:$0xff]  }
  0x9d   :  { %1296 = vmatprep.subr.bf16.mxu0 %v3431_v2  ;;  %3169 = vmatprep.subr.bf16.mxu1 %v3745_v9  ;;  %v3517_v2 = vld [vmem:[#allocation5 + $0x71c] ss:$144 sps:$4 sm:$0xff]  }
  0x9f   :  { %1247 = vmatmul.mubr.bf16.vlgmr.msra.gmra.mxu0 %v3775_v38  ;;  %1288 = vmatmul.mubr.bf16.vlgmr.msra.gmra.mxu1 %v3775_v38 }
  0xa0   :  { %1297 = vmatpush1.bf16.msra.mxu0 %v3429_v3  ;;  %3170 = vmatpush3.bf16.msra.mxu1 %v3432_v4  ;;  %v3520_v3 = vld [vmem:[#allocation5 + $0x724] ss:$144 sps:$4 sm:$0xff]   ;;  %v3515_v4 = vld [vmem:[#allocation5 + $0x718] ss:$144 sps:$4 sm:$0xff]  }
  0xa1   :  { %1298 = vmatprep.subr.bf16.mxu0 %v3435_v5  ;;  %3171 = vmatprep.subr.bf16.mxu1 %v3745_v9  ;;  %v3518_v5 = vld [vmem:[#allocation5 + $0x720] ss:$144 sps:$4 sm:$0xff]  }
  0xa2   :  { %1328 = vmatprep.mubr.bf16.mxu0 %v3744_v0  ;;  %3185 = vmatprep.mubr.msk.bf16.mxu1 %vm3746_vm0, %v3745_v9 }
  0xa4   :  { %1299 = vmatpush1.bf16.msra.mxu0 %v3433_v6  ;;  %3172 = vmatpush3.bf16.msra.mxu1 %v3436_v7  ;;  %v3523_v6 = vld [vmem:[#allocation5 + $0x5fc] ss:$144 sps:$4 sm:$0xff]   ;;  %v3526_v7 = vld [vmem:[#allocation5 + $0x604] ss:$144 sps:$4 sm:$0xff]  }
  0xa5   :  { %1300 = vmatprep.subr.bf16.mxu0 %v3439_v8  ;;  %3173 = vmatprep.subr.bf16.mxu1 %v3745_v9  ;;  %v3521_v8 = vld [vmem:[#allocation5 + $0x5f8] ss:$144 sps:$4 sm:$0xff]  }
  0xa8   :  { %1301 = vmatpush1.bf16.msra.mxu0 %v3437_v10  ;;  %3174 = vmatpush3.bf16.msra.mxu1 %v3440_v11  ;;  %v3524_v10 = vld [vmem:[#allocation5 + $0x600] ss:$144 sps:$4 sm:$0xff]   ;;  %v3529_v11 = vld [vmem:[#allocation5 + $0x4dc] ss:$144 sps:$4 sm:$0xff]  }
  0xa9   :  { %1302 = vmatprep.subr.bf16.mxu0 %v3443_v12  ;;  %3175 = vmatprep.subr.bf16.mxu1 %v3745_v9  ;;  %v3532_v12 = vld [vmem:[#allocation5 + $0x4e4] ss:$144 sps:$4 sm:$0xff]  }
  0xac   :  { %1303 = vmatpush1.bf16.msra.mxu0 %v3441_v13  ;;  %3176 = vmatpush3.bf16.msra.mxu1 %v3444_v14  ;;  %v3527_v13 = vld [vmem:[#allocation5 + $0x4d8] ss:$144 sps:$4 sm:$0xff]   ;;  %v3530_v14 = vld [vmem:[#allocation5 + $0x4e0] ss:$144 sps:$4 sm:$0xff]  }
  0xad   :  { %1304 = vmatprep.subr.bf16.mxu0 %v3447_v15  ;;  %3177 = vmatprep.subr.bf16.mxu1 %v3745_v9  ;;  %v3535_v15 = vld [vmem:[#allocation5 + $0x3bc] ss:$144 sps:$4 sm:$0xff]  }
  0xb0   :  { %1305 = vmatpush1.bf16.msra.mxu0 %v3445_v16  ;;  %3178 = vmatpush3.bf16.msra.mxu1 %v3448_v17  ;;  %v3538_v16 = vld [vmem:[#allocation5 + $0x3c4] ss:$144 sps:$4 sm:$0xff]   ;;  %v3533_v17 = vld [vmem:[#allocation5 + $0x3b8] ss:$144 sps:$4 sm:$0xff]  }
  0xb1   :  { %1306 = vmatprep.subr.bf16.mxu0 %v3451_v18  ;;  %3179 = vmatprep.subr.bf16.mxu1 %v3745_v9  ;;  %v3536_v18 = vld [vmem:[#allocation5 + $0x3c0] ss:$144 sps:$4 sm:$0xff]  }
  0xb4   :  { %1307 = vmatpush1.bf16.msra.mxu0 %v3449_v19  ;;  %3180 = vmatpush3.bf16.msra.mxu1 %v3452_v20  ;;  %v3541_v19 = vld [vmem:[#allocation5 + $0x29c] ss:$144 sps:$4 sm:$0xff]   ;;  %v3544_v20 = vld [vmem:[#allocation5 + $0x2a4] ss:$144 sps:$4 sm:$0xff]  }
  0xb5   :  { %1308 = vmatprep.subr.bf16.mxu0 %v3455_v21  ;;  %3181 = vmatprep.subr.bf16.mxu1 %v3745_v9  ;;  %v3539_v21 = vld [vmem:[#allocation5 + $0x298] ss:$144 sps:$4 sm:$0xff]  }
  0xb8   :  { %1309 = vmatpush1.bf16.msra.mxu0 %v3453_v22  ;;  %3182 = vmatpush3.bf16.msra.mxu1 %v3456_v23  ;;  %v3542_v22 = vld [vmem:[#allocation5 + $0x2a0] ss:$144 sps:$4 sm:$0xff]   ;;  %v3547_v23 = vld [vmem:[#allocation5 + $0x17c] ss:$144 sps:$4 sm:$0xff]  }
  0xb9   :  { %1310 = vmatprep.subr.bf16.mxu0 %v3459_v24  ;;  %3183 = vmatprep.subr.bf16.mxu1 %v3745_v9  ;;  %v3550_v24 = vld [vmem:[#allocation5 + $0x184] ss:$144 sps:$4 sm:$0xff]  }
  0xbc   :  { %1311 = vmatpush1.bf16.msra.mxu0 %v3457_v25  ;;  %3184 = vmatpush3.bf16.msra.mxu1 %v3460_v26  ;;  %v3545_v25 = vld [vmem:[#allocation5 + $0x178] ss:$144 sps:$4 sm:$0xff]   ;;  %v3548_v26 = vld [vmem:[#allocation5 + $0x180] ss:$144 sps:$4 sm:$0xff]  }
  0xbd   :  { %1852 = vmatprep.subr.bf16.mxu0 %v3463_v27  ;;  %1893 = vmatprep.subr.bf16.mxu1 %v3466_v28  ;;  %v3553_v27 = vld [vmem:[#allocation5 + $0x5c] ss:$144 sps:$4 sm:$0xff]   ;;  %v3556_v28 = vld [vmem:[#allocation5 + $0x64] ss:$144 sps:$4 sm:$0xff]  }
  0xbf   :  { %1329 = vmatmul.mubr.bf16.vlgmr.msra.gmra.mxu0 %v3775_v38  ;;  %3186 = vmatmul.mubr.bf16.vlgmr.msra.gmra.mxu1 %v3775_v38 }
  0xc0   :  { %1853 = vmatpush1.bf16.msra.mxu0 %v3461_v29  ;;  %1894 = vmatpush1.bf16.msra.mxu1 %v3464_v30  ;;  %v3551_v29 = vld [vmem:[#allocation5 + $0x58] ss:$144 sps:$4 sm:$0xff]   ;;  %v3554_v30 = vld [vmem:[#allocation5 + $0x60] ss:$144 sps:$4 sm:$0xff]  }
  0xc1   :  { %1854 = vmatprep.subr.bf16.mxu0 %v3469_v31  ;;  %1895 = vmatprep.subr.bf16.mxu1 %v3472_v32  ;;  %v3559_v31 = vld [vmem:[#allocation5 + $0x850] ss:$144 sps:$4 sm:$0xff]   ;;  %v3557_v32 = vld [vmem:[#allocation5 + $0x84c] ss:$144 sps:$4 sm:$0xff]  }
  0xc2   :  { %1884 = vmatprep.mubr.bf16.mxu0 %v3744_v0  ;;  %1925 = vmatprep.mubr.bf16.mxu1 %v3744_v0 }
  0xc4   :  { %1855 = vmatpush1.bf16.msra.mxu0 %v3467_v34  ;;  %1896 = vmatpush1.bf16.msra.mxu1 %v3470_v35  ;;  %v3560_v34 = vld [vmem:[#allocation5 + $0x848] ss:$144 sps:$4 sm:$0xff]   ;;  %v3563_v35 = vld [vmem:[#allocation5 + $0x730] ss:$144 sps:$4 sm:$0xff]  }
  0xc5   :  { %1856 = vmatprep.subr.bf16.mxu0 %v3475_v36  ;;  %1897 = vmatprep.subr.bf16.mxu1 %v3478_v37 }
  0xc8   :  { %1857 = vmatpush1.bf16.msra.mxu0 %v3473_v39  ;;  %1898 = vmatpush1.bf16.msra.mxu1 %v3476_v40  ;;  %v3561_v39 = vld [vmem:[#allocation5 + $0x72c] ss:$144 sps:$4 sm:$0xff]   ;;  %v3564_v40 = vld [vmem:[#allocation5 + $0x728] ss:$144 sps:$4 sm:$0xff]  }
  0xc9   :  { %1858 = vmatprep.subr.bf16.mxu0 %v3481_v41  ;;  %1899 = vmatprep.subr.bf16.mxu1 %v3484_v42 }
  0xcc   :  { %1859 = vmatpush1.bf16.msra.mxu0 %v3479_v43  ;;  %1900 = vmatpush1.bf16.msra.mxu1 %v3482_v44  ;;  %v3567_v43 = vld [vmem:[#allocation5 + $0x610] ss:$144 sps:$4 sm:$0xff]  }
  0xcd   :  { %1860 = vmatprep.subr.bf16.mxu0 %v3487_v45  ;;  %1901 = vmatprep.subr.bf16.mxu1 %v3490_v46  ;;  %v3565_v46 = vld [vmem:[#allocation5 + $0x60c] ss:$144 sps:$4 sm:$0xff]  }
  0xd0   :  { %1861 = vmatpush1.bf16.msra.mxu0 %v3485_v47  ;;  %1902 = vmatpush1.bf16.msra.mxu1 %v3488_v48  ;;  %v3568_v47 = vld [vmem:[#allocation5 + $0x608] ss:$144 sps:$4 sm:$0xff]  }
  0xd1   :  { %1862 = vmatprep.subr.bf16.mxu0 %v3493_v49  ;;  %1903 = vmatprep.subr.bf16.mxu1 %v3496_v50  ;;  %v3571_v50 = vld [vmem:[#allocation5 + $0x4f0] ss:$144 sps:$4 sm:$0xff]  }
  0xd4   :  { %1863 = vmatpush1.bf16.msra.mxu0 %v3491_v51  ;;  %1904 = vmatpush1.bf16.msra.mxu1 %v3494_v52  ;;  %v3569_v51 = vld [vmem:[#allocation5 + $0x4ec] ss:$144 sps:$4 sm:$0xff]   ;;  %v3572_v52 = vld [vmem:[#allocation5 + $0x4e8] ss:$144 sps:$4 sm:$0xff]  }
  0xd5   :  { %1864 = vmatprep.subr.bf16.mxu0 %v3499_v53  ;;  %1905 = vmatprep.subr.bf16.mxu1 %v3502_v54  ;;  %v3575_v53 = vld [vmem:[#allocation5 + $0x3d0] ss:$144 sps:$4 sm:$0xff]   ;;  %v3573_v54 = vld [vmem:[#allocation5 + $0x3cc] ss:$144 sps:$4 sm:$0xff]  }
  0xd8   :  { %1865 = vmatpush1.bf16.msra.mxu0 %v3497_v55  ;;  %1906 = vmatpush1.bf16.msra.mxu1 %v3500_v56  ;;  %v3576_v55 = vld [vmem:[#allocation5 + $0x3c8] ss:$144 sps:$4 sm:$0xff]   ;;  %v3579_v56 = vld [vmem:[#allocation5 + $0x2b0] ss:$144 sps:$4 sm:$0xff]  }
  0xd9   :  { %1866 = vmatprep.subr.bf16.mxu0 %v3505_v57  ;;  %1907 = vmatprep.subr.bf16.mxu1 %v3508_v58  ;;  %v3577_v57 = vld [vmem:[#allocation5 + $0x2ac] ss:$144 sps:$4 sm:$0xff]   ;;  %v3580_v58 = vld [vmem:[#allocation5 + $0x2a8] ss:$144 sps:$4 sm:$0xff]  }
  0xdc   :  { %1867 = vmatpush1.bf16.msra.mxu0 %v3503_v59  ;;  %1908 = vmatpush1.bf16.msra.mxu1 %v3506_v60  ;;  %v3583_v59 = vld [vmem:[#allocation5 + $0x190] ss:$144 sps:$4 sm:$0xff]   ;;  %v3581_v60 = vld [vmem:[#allocation5 + $0x18c] ss:$144 sps:$4 sm:$0xff]  }
  0xdd   :  { %1934 = vmatprep.subr.bf16.mxu0 %v3511_v61  ;;  %1975 = vmatprep.subr.bf16.mxu1 %v3514_v62  ;;  %v3584_v61 = vld [vmem:[#allocation5 + $0x188] ss:$144 sps:$4 sm:$0xff]   ;;  %v3587_v62 = vld [vmem:[#allocation5 + $0x70] ss:$144 sps:$4 sm:$0xff]  }
  0xdf   :  { %1885 = vmatmul.mubr.bf16.vlgmr.msra.gmra.mxu0 %v3775_v38  ;;  %1926 = vmatmul.mubr.bf16.vlgmr.msra.gmra.mxu1 %v3775_v38 }
  0xe0   :  { %1935 = vmatpush1.bf16.msra.mxu0 %v3509_v63  ;;  %1976 = vmatpush1.bf16.msra.mxu1 %v3512_v1  ;;  %v3585_v63 = vld [vmem:[#allocation5 + $0x6c] ss:$144 sps:$4 sm:$0xff]   ;;  %v3588_v1 = vld [vmem:[#allocation5 + $0x68] ss:$144 sps:$4 sm:$0xff]  }
  0xe1   :  { %1936 = vmatprep.subr.bf16.mxu0 %v3517_v2  ;;  %1977 = vmatprep.subr.bf16.mxu1 %v3520_v3  ;;  %v3591_v2 = vld [vmem:[#allocation5 + $0x858] ss:$144 sps:$4 sm:$0xff]   ;;  %v3594_v3 = vld [vmem:[#allocation5 + $0x860] ss:$144 sps:$4 sm:$0xff]  }
  0xe2   :  { %1966 = vmatprep.mubr.bf16.mxu0 %v3744_v0  ;;  %2007 = vmatprep.mubr.bf16.mxu1 %v3744_v0 }
  0xe4   :  { %1937 = vmatpush1.bf16.msra.mxu0 %v3515_v4  ;;  %1978 = vmatpush1.bf16.msra.mxu1 %v3518_v5  ;;  %v3589_v4 = vld [vmem:[#allocation5 + $0x854] ss:$144 sps:$4 sm:$0xff]   ;;  %v3592_v5 = vld [vmem:[#allocation5 + $0x85c] ss:$144 sps:$4 sm:$0xff]  }
  0xe5   :  { %1938 = vmatprep.subr.bf16.mxu0 %v3523_v6  ;;  %1979 = vmatprep.subr.bf16.mxu1 %v3526_v7  ;;  %v3597_v6 = vld [vmem:[#allocation5 + $0x738] ss:$144 sps:$4 sm:$0xff]   ;;  %v3600_v7 = vld [vmem:[#allocation5 + $0x740] ss:$144 sps:$4 sm:$0xff]  }
  0xe8   :  { %1939 = vmatpush1.bf16.msra.mxu0 %v3521_v8  ;;  %1980 = vmatpush1.bf16.msra.mxu1 %v3524_v10 }
  0xe9   :  { %1940 = vmatprep.subr.bf16.mxu0 %v3529_v11  ;;  %1981 = vmatprep.subr.bf16.mxu1 %v3532_v12  ;;  %v3595_v11 = vld [vmem:[#allocation5 + $0x734] ss:$144 sps:$4 sm:$0xff]   ;;  %v3598_v12 = vld [vmem:[#allocation5 + $0x73c] ss:$144 sps:$4 sm:$0xff]  }
  0xec   :  { %1941 = vmatpush1.bf16.msra.mxu0 %v3527_v13  ;;  %1982 = vmatpush1.bf16.msra.mxu1 %v3530_v14 }
  0xed   :  { %1942 = vmatprep.subr.bf16.mxu0 %v3535_v15  ;;  %1983 = vmatprep.subr.bf16.mxu1 %v3538_v16  ;;  %v3603_v15 = vld [vmem:[#allocation5 + $0x618] ss:$144 sps:$4 sm:$0xff]   ;;  %v3606_v16 = vld [vmem:[#allocation5 + $0x620] ss:$144 sps:$4 sm:$0xff]  }
  0xf0   :  { %1943 = vmatpush1.bf16.msra.mxu0 %v3533_v17  ;;  %1984 = vmatpush1.bf16.msra.mxu1 %v3536_v18 }
  0xf1   :  { %1944 = vmatprep.subr.bf16.mxu0 %v3541_v19  ;;  %1985 = vmatprep.subr.bf16.mxu1 %v3544_v20  ;;  %v3601_v19 = vld [vmem:[#allocation5 + $0x614] ss:$144 sps:$4 sm:$0xff]   ;;  %v3604_v20 = vld [vmem:[#allocation5 + $0x61c] ss:$144 sps:$4 sm:$0xff]  }
  0xf4   :  { %1945 = vmatpush1.bf16.msra.mxu0 %v3539_v21  ;;  %1986 = vmatpush1.bf16.msra.mxu1 %v3542_v22 }
  0xf5   :  { %1946 = vmatprep.subr.bf16.mxu0 %v3547_v23  ;;  %1987 = vmatprep.subr.bf16.mxu1 %v3550_v24  ;;  %v3609_v23 = vld [vmem:[#allocation5 + $0x4f8] ss:$144 sps:$4 sm:$0xff]   ;;  %v3612_v24 = vld [vmem:[#allocation5 + $0x500] ss:$144 sps:$4 sm:$0xff]  }
  0xf8   :  { %1947 = vmatpush1.bf16.msra.mxu0 %v3545_v25  ;;  %1988 = vmatpush1.bf16.msra.mxu1 %v3548_v26 }
  0xf9   :  { %1948 = vmatprep.subr.bf16.mxu0 %v3553_v27  ;;  %1989 = vmatprep.subr.bf16.mxu1 %v3556_v28  ;;  %v3607_v27 = vld [vmem:[#allocation5 + $0x4f4] ss:$144 sps:$4 sm:$0xff]   ;;  %v3610_v28 = vld [vmem:[#allocation5 + $0x4fc] ss:$144 sps:$4 sm:$0xff]  }
  0xfc   :  { %1949 = vmatpush1.bf16.msra.mxu0 %v3551_v29  ;;  %1990 = vmatpush1.bf16.msra.mxu1 %v3554_v30  ;;  %v3615_v29 = vld [vmem:[#allocation5 + $0x3d8] ss:$144 sps:$4 sm:$0xff]   ;;  %v3618_v30 = vld [vmem:[#allocation5 + $0x3e0] ss:$144 sps:$4 sm:$0xff]  }
  0xfd   :  { %3189 = vmatprep.subr.bf16.mxu0 %v3745_v9  ;;  %2531 = vmatprep.subr.bf16.mxu1 %v3559_v31 }
  0xff   :  { %v3820_v36 = vpop.f32.mrf.mxu0  ;;  %v3822_v37 = vpop.f32.mrf.mxu1  ;;  %1967 = vmatmul.mubr.bf16.vlgmr.msra.gmra.mxu0 %v3775_v38  ;;  %2008 = vmatmul.mubr.bf16.vlgmr.msra.gmra.mxu1 %v3775_v38 }
 0x100   :  { %3190 = vmatpush3.bf16.msra.mxu0 %v3560_v34  ;;  %2532 = vmatpush1.bf16.msra.mxu1 %v3557_v32  ;;  %v698_v25 = vand.u32 2147483647, %v3820_v36  ;;  %v700_v31 = vand.u32 2147483647, %v3822_v37  ;;  %v3613_v34 = vld [vmem:[#allocation5 + $0x3d4] ss:$144 sps:$4 sm:$0xff]  }
 0x101   :  { %v3826_v41 = vpop.f32.mrf.mxu0  ;;  %v3828_v42 = vpop.f32.mrf.mxu1  ;;  %3191 = vmatprep.subr.bf16.mxu0 %v3745_v9  ;;  %2533 = vmatprep.subr.bf16.mxu1 %v3563_v35  ;;  %v3616_v35 = vld [vmem:[#allocation5 + $0x3dc] ss:$144 sps:$4 sm:$0xff]   ;;  %v3621_v36 = vld [vmem:[#allocation5 + $0x2b8] ss:$144 sps:$4 sm:$0xff]  }
 0x102   :  { %3205 = vmatprep.mubr.msk.bf16.mxu0 %vm3746_vm0, %v3745_v9  ;;  %2563 = vmatprep.mubr.bf16.mxu1 %v3744_v0  ;;  %v699_v26 = vand.u32 2147483647, %v3826_v41  ;;  %v3627_v37 = vld [vmem:[#allocation5 + $0x198] ss:$144 sps:$4 sm:$0xff]  }
 0x103   :  { %v532_v44 = vpop.f32.mrf.mxu0  ;;  %v573_v45 = vpop.f32.mrf.mxu1 }
 0x104   :  { %3192 = vmatpush3.bf16.msra.mxu0 %v3564_v40  ;;  %2534 = vmatpush1.bf16.msra.mxu1 %v3561_v39  ;;  %v707_v32 = vadd.f32 %v699_v26, %v698_v25  ;;  %v3624_v39 = vld [vmem:[#allocation5 + $0x2c0] ss:$144 sps:$4 sm:$0xff]   ;;  %v701_v40 = vand.u32 2147483647, %v3828_v42  ;;  %v3619_v44 = vld [vmem:[#allocation5 + $0x2b4] ss:$144 sps:$4 sm:$0xff]  }
 0x105   :  { %v533_v48 = vpop.f32.mrf.mxu0  ;;  %v574_v49 = vpop.f32.mrf.mxu1  ;;  %3193 = vmatprep.subr.bf16.mxu0 %v3745_v9  ;;  %2535 = vmatprep.subr.bf16.mxu1 %v3567_v43  ;;  %v3622_v45 = vld [vmem:[#allocation5 + $0x2bc] ss:$144 sps:$4 sm:$0xff]   ;;  %v3633_v42 = vld [vmem:[#allocation5 + $0x78] ss:$144 sps:$4 sm:$0xff]   ;;  %v3661_v26 = vld [vmem:[#allocation5 + $0x1a4] ss:$144 sps:$4 sm:$0xff]  }
 0x106   :  { %v708_v41 = vadd.f32 %v707_v32, %v700_v31  ;;  %v3663_v25 = vld [vmem:[#allocation5 + $0x1a8] ss:$144 sps:$4 sm:$0xff]  }
 0x108   :  { %3194 = vmatpush3.bf16.msra.mxu0 %v3568_v47  ;;  %2536 = vmatpush1.bf16.msra.mxu1 %v3565_v46  ;;  %v3630_v46 = vld [vmem:[#allocation5 + $0x1a0] ss:$144 sps:$4 sm:$0xff]   ;;  %v709_v47 = vadd.f32 %v708_v41, %v701_v40 }
 0x109   :  { %3195 = vmatprep.subr.bf16.mxu0 %v3745_v9  ;;  %2537 = vmatprep.subr.bf16.mxu1 %v3571_v50  ;;  %v3625_v50 = vld [vmem:[#allocation5 + $0x194] ss:$144 sps:$4 sm:$0xff]  }
 0x10c   :  { %3196 = vmatpush3.bf16.msra.mxu0 %v3572_v52  ;;  %2538 = vmatpush1.bf16.msra.mxu1 %v3569_v51  ;;  %v3628_v51 = vld [vmem:[#allocation5 + $0x19c] ss:$144 sps:$4 sm:$0xff]   ;;  %v3636_v52 = vld [vmem:[#allocation5 + $0x80] ss:$144 sps:$4 sm:$0xff]  }
 0x10d   :  { %3197 = vmatprep.subr.bf16.mxu0 %v3745_v9  ;;  %2539 = vmatprep.subr.bf16.mxu1 %v3575_v53 }
 0x110   :  { %3198 = vmatpush3.bf16.msra.mxu0 %v3576_v55  ;;  %2540 = vmatpush1.bf16.msra.mxu1 %v3573_v54  ;;  %v3631_v55 = vld [vmem:[#allocation5 + $0x74] ss:$144 sps:$4 sm:$0xff]  }
 0x111   :  { %3199 = vmatprep.subr.bf16.mxu0 %v3745_v9  ;;  %2541 = vmatprep.subr.bf16.mxu1 %v3579_v56  ;;  %v3634_v56 = vld [vmem:[#allocation5 + $0x7c] ss:$144 sps:$4 sm:$0xff]  }
 0x114   :  { %3200 = vmatpush3.bf16.msra.mxu0 %v3580_v58  ;;  %2542 = vmatpush1.bf16.msra.mxu1 %v3577_v57  ;;  %v3639_v57 = vld [vmem:[#allocation5 + $0x868] ss:$144 sps:$4 sm:$0xff]  }
 0x115   :  { %3201 = vmatprep.subr.bf16.mxu0 %v3745_v9  ;;  %2543 = vmatprep.subr.bf16.mxu1 %v3583_v59  ;;  %v3637_v59 = vld [vmem:[#allocation5 + $0x864] ss:$144 sps:$4 sm:$0xff]  }
 0x118   :  { %3202 = vmatpush3.bf16.msra.mxu0 %v3584_v61  ;;  %2544 = vmatpush1.bf16.msra.mxu1 %v3581_v60  ;;  %v3640_v60 = vld [vmem:[#allocation5 + $0x86c] ss:$144 sps:$4 sm:$0xff]  }
 0x119   :  { %3203 = vmatprep.subr.bf16.mxu0 %v3745_v9  ;;  %2545 = vmatprep.subr.bf16.mxu1 %v3587_v62  ;;  %v3643_v62 = vld [vmem:[#allocation5 + $0x748] ss:$144 sps:$4 sm:$0xff]  }
 0x11c   :  { %3204 = vmatpush3.bf16.msra.mxu0 %v3588_v1  ;;  %2546 = vmatpush1.bf16.msra.mxu1 %v3585_v63 }
 0x11d   :  { %2572 = vmatprep.subr.bf16.mxu0 %v3591_v2  ;;  %2613 = vmatprep.subr.bf16.mxu1 %v3594_v3  ;;  %v3641_v3 = vld [vmem:[#allocation5 + $0x744] ss:$144 sps:$4 sm:$0xff]  }
 0x11f   :  { %v610_v8 = vpop.f32.mrf.mxu0  ;;  %v3840_v10 = vpop.f32.mrf.mxu1  ;;  %3206 = vmatmul.mubr.bf16.vlgmr.msra.gmra.mxu0 %v3775_v38  ;;  %2564 = vmatmul.mubr.bf16.vlgmr.msra.gmra.mxu1 %v3775_v38 }
 0x120   :  { %2573 = vmatpush1.bf16.msra.mxu0 %v3589_v4  ;;  %2614 = vmatpush1.bf16.msra.mxu1 %v3592_v5  ;;  %v702_v43 = vand.u32 2147483647, %v610_v8  ;;  %v704_v53 = vand.u32 2147483647, %v3840_v10  ;;  %v3644_v4 = vld [vmem:[#allocation5 + $0x74c] ss:$144 sps:$4 sm:$0xff]  }
 0x121   :  { %v3844_v13 = vpop.f32.mrf.mxu0  ;;  %v3846_v14 = vpop.f32.mrf.mxu1  ;;  %2574 = vmatprep.subr.bf16.mxu0 %v3597_v6  ;;  %2615 = vmatprep.subr.bf16.mxu1 %v3600_v7  ;;  %v3647_v8 = vld [vmem:[#allocation5 + $0x628] ss:$144 sps:$4 sm:$0xff]  }
 0x122   :  { %2604 = vmatprep.mubr.bf16.mxu0 %v3744_v0  ;;  %2645 = vmatprep.mubr.bf16.mxu1 %v3744_v0  ;;  %v710_v48 = vadd.f32 %v709_v47, %v702_v43  ;;  %v703_v49 = vand.u32 2147483647, %v3844_v13  ;;  %v705_v58 = vand.u32 2147483647, %v3846_v14  ;;  %v3645_v13 = vld [vmem:[#allocation5 + $0x624] ss:$144 sps:$4 sm:$0xff]  }
 0x123   :  { %v614_v17 = vpop.f32.mrf.mxu0  ;;  %v655_v18 = vpop.f32.mrf.mxu1  ;;  %v3648_v14 = vld [vmem:[#allocation5 + $0x62c] ss:$144 sps:$4 sm:$0xff]  }
 0x124   :  { %2575 = vmatpush1.bf16.msra.mxu0 %v3595_v11  ;;  %2616 = vmatpush1.bf16.msra.mxu1 %v3598_v12  ;;  %v711_v54 = vadd.f32 %v710_v48, %v703_v49  ;;  %v3651_v17 = vld [vmem:[#allocation5 + $0x508] ss:$144 sps:$4 sm:$0xff]   ;;  %v3649_v18 = vld [vmem:[#allocation5 + $0x504] ss:$144 sps:$4 sm:$0xff]  }
 0x125   :  { %v615_v21 = vpop.f32.mrf.mxu0  ;;  %v656_v22 = vpop.f32.mrf.mxu1  ;;  %2576 = vmatprep.subr.bf16.mxu0 %v3603_v15  ;;  %2617 = vmatprep.subr.bf16.mxu1 %v3606_v16 }
 0x126   :  { %v712_v61 = vadd.f32 %v711_v54, %v704_v53  ;;  %v3656_v21 = vld [vmem:[#allocation5 + $0x3ec] ss:$144 sps:$4 sm:$0xff]   ;;  %v3659_v22 = vld [vmem:[#allocation5 + $0x2c8] ss:$144 sps:$4 sm:$0xff]  }
 0x128   :  { %2577 = vmatpush1.bf16.msra.mxu0 %v3601_v19  ;;  %2618 = vmatpush1.bf16.msra.mxu1 %v3604_v20  ;;  %v713_v5 = vadd.f32 %v712_v61, %v705_v58  ;;  %v3655_v19 = vld [vmem:[#allocation5 + $0x3e8] ss:$144 sps:$4 sm:$0xff]   ;;  %v3653_v20 = vld [vmem:[#allocation5 + $0x3e4] ss:$144 sps:$4 sm:$0xff]  }
 0x129   :  { %2578 = vmatprep.subr.bf16.mxu0 %v3609_v23  ;;  %2619 = vmatprep.subr.bf16.mxu1 %v3612_v24  ;;  %v3657_v23 = vld [vmem:[#allocation5 + $0x2c4] ss:$144 sps:$4 sm:$0xff]   ;;  %v3660_v24 = vld [vmem:[#allocation5 + $0x2cc] ss:$144 sps:$4 sm:$0xff]  }
 0x12c   :  { %2579 = vmatpush1.bf16.msra.mxu0 %v3607_v27  ;;  %2620 = vmatpush1.bf16.msra.mxu1 %v3610_v28  ;;  %v3664_v27 = vld [vmem:[#allocation5 + $0x1ac] ss:$144 sps:$4 sm:$0xff]   ;;  %v3667_v28 = vld [vmem:[#allocation5 + $0x88] ss:$144 sps:$4 sm:$0xff]  }
 0x12d   :  { %2580 = vmatprep.subr.bf16.mxu0 %v3615_v29  ;;  %2621 = vmatprep.subr.bf16.mxu1 %v3618_v30  ;;  %v3665_v29 = vld [vmem:[#allocation5 + $0x84] ss:$144 sps:$4 sm:$0xff]   ;;  %v3668_v30 = vld [vmem:[#allocation5 + $0x8c] ss:$144 sps:$4 sm:$0xff]  }
 0x130   :  { %2581 = vmatpush1.bf16.msra.mxu0 %v3613_v34  ;;  %2622 = vmatpush1.bf16.msra.mxu1 %v3616_v35 }
 0x131   :  { %2582 = vmatprep.subr.bf16.mxu0 %v3621_v36  ;;  %2623 = vmatprep.subr.bf16.mxu1 %v3624_v39 }
 0x134   :  { %2583 = vmatpush1.bf16.msra.mxu0 %v3619_v44  ;;  %2624 = vmatpush1.bf16.msra.mxu1 %v3622_v45 }
 0x135   :  { %2584 = vmatprep.subr.bf16.mxu0 %v3627_v37  ;;  %2625 = vmatprep.subr.bf16.mxu1 %v3630_v46 }
 0x138   :  { %2585 = vmatpush1.bf16.msra.mxu0 %v3625_v50  ;;  %2626 = vmatpush1.bf16.msra.mxu1 %v3628_v51 }
 0x139   :  { %2586 = vmatprep.subr.bf16.mxu0 %v3633_v42  ;;  %2627 = vmatprep.subr.bf16.mxu1 %v3636_v52 }
 0x13c   :  { %2587 = vmatpush1.bf16.msra.mxu0 %v3631_v55  ;;  %2628 = vmatpush1.bf16.msra.mxu1 %v3634_v56 }
 0x13d   :  { %2654 = vmatprep.subr.bf16.mxu0 %v3639_v57  ;;  %3209 = vmatprep.subr.bf16.mxu1 %v3745_v9 }
 0x13f   :  { %v692_v63 = vpop.f32.mrf.mxu0  ;;  %v3858_v1 = vpop.f32.mrf.mxu1  ;;  %2605 = vmatmul.mubr.bf16.vlgmr.msra.gmra.mxu0 %v3775_v38  ;;  %2646 = vmatmul.mubr.bf16.vlgmr.msra.gmra.mxu1 %v3775_v38 }
 0x140   :  { %v706_v2 = vand.u32 2147483647, %v692_v63  ;;  %2655 = vmatpush1.bf16.msra.mxu0 %v3637_v59  ;;  %3210 = vmatpush3.bf16.msra.mxu1 %v3640_v60  ;;  %v1377_v43 = vand.u32 2147483647, %v3858_v1 }
 0x141   :  { %v3167_v6 = vpop.f32.mrf.mxu0  ;;  %v3862_v7 = vpop.f32.mrf.mxu1  ;;  %2656 = vmatprep.subr.bf16.mxu0 %v3643_v62  ;;  %3211 = vmatprep.subr.bf16.mxu1 %v3745_v9 }
 0x142   :  { %v714_v10 = vadd.f32 %v713_v5, %v706_v2  ;;  %2686 = vmatprep.mubr.bf16.mxu0 %v3744_v0  ;;  %3225 = vmatprep.mubr.msk.bf16.mxu1 %vm3746_vm0, %v3745_v9  ;;  %v3652_v0 = vld [vmem:[#allocation5 + $0x50c] ss:$144 sps:$4 sm:$0xff]   ;;  %v1378_v44 = vand.u32 2147483647, %v3862_v7 }
 0x143   :  { %v695_v11 = vpop.f32.mrf.mxu0  ;;  %v1211_v12 = vpop.f32.mrf.mxu1  ;;  %v3671_v5 = vld [vmem:[#allocation2 + $0x8] sm:$0xff] }
 0x144   :  { %2657 = vmatpush1.bf16.msra.mxu0 %v3641_v3  ;;  %3212 = vmatpush3.bf16.msra.mxu1 %v3644_v4  ;;  %v2778_v6 = vand.u32 2147483647, %v3671_v5  ;;  %v2780_v11 = vand.u32 2147483647, %v3771_v33 }
 0x145   :  { %715 = vadd.xlane.f32.xlu0 %v714_v10  ;;  %v3168_v15 = vpop.f32.mrf.mxu0  ;;  %v1212_v16 = vpop.f32.mrf.mxu1  ;;  %2658 = vmatprep.subr.bf16.mxu0 %v3647_v8 }
 0x146   :  { %3213 = vmatprep.subr.bf16.mxu1 %v3745_v9  ;;  %v3878_v10 = vadd.f32 1.0, %v2778_v6 }
 0x148   :  { %2659 = vmatpush1.bf16.msra.mxu0 %v3645_v13  ;;  %3214 = vmatpush3.bf16.msra.mxu1 %v3648_v14  ;;  %v2781_v14 = vmul.f32 %v2780_v11, %v3878_v10 }
 0x149   :  { %2660 = vmatprep.subr.bf16.mxu0 %v3651_v17  ;;  %3215 = vmatprep.subr.bf16.mxu1 %v3745_v9 }
 0x14c   :  { %2661 = vmatpush1.bf16.msra.mxu0 %v3649_v18  ;;  %3216 = vmatpush3.bf16.msra.mxu1 %v3652_v0 }
 0x14d   :  { %2662 = vmatprep.subr.bf16.mxu0 %v3655_v19  ;;  %3217 = vmatprep.subr.bf16.mxu1 %v3745_v9 }
 0x150   :  { %2663 = vmatpush1.bf16.msra.mxu0 %v3653_v20  ;;  %3218 = vmatpush3.bf16.msra.mxu1 %v3656_v21 }
 0x151   :  { %2664 = vmatprep.subr.bf16.mxu0 %v3659_v22  ;;  %3219 = vmatprep.subr.bf16.mxu1 %v3745_v9 }
 0x154   :  { %2665 = vmatpush1.bf16.msra.mxu0 %v3657_v23  ;;  %3220 = vmatpush3.bf16.msra.mxu1 %v3660_v24 }
 0x155   :  { %2666 = vmatprep.subr.bf16.mxu0 %v3663_v25  ;;  %3221 = vmatprep.subr.bf16.mxu1 %v3745_v9 }
 0x158   :  { %2667 = vmatpush1.bf16.msra.mxu0 %v3661_v26  ;;  %3222 = vmatpush3.bf16.msra.mxu1 %v3664_v27 }
 0x159   :  { %2668 = vmatprep.subr.bf16.mxu0 %v3667_v28  ;;  %3223 = vmatprep.subr.bf16.mxu1 %v3745_v9  ;;  %v1386_v9 = vadd.f32 %v1378_v44, %v1377_v43 }
 0x15c   :  { %2669 = vmatpush1.bf16.msra.mxu0 %v3665_v29  ;;  %3224 = vmatpush3.bf16.msra.mxu1 %v3668_v30 }
 0x15f   :  { %v1248_v31 = vpop.f32.mrf.mxu0  ;;  %v1289_v32 = vpop.f32.mrf.mxu1  ;;  %2687 = vmatmul.mubr.bf16.vlgmr.msra.gmra.mxu0 %v3775_v38  ;;  %3226 = vmatmul.mubr.bf16.vlgmr.msra.gmra.mxu1 %v3775_v38 }
 0x160   :  { %v1379_v45 = vand.u32 2147483647, %v1248_v31  ;;  %v1381_v47 = vand.u32 2147483647, %v1289_v32 }
 0x161   :  { %v1250_v34 = vpop.f32.mrf.mxu0  ;;  %v1291_v35 = vpop.f32.mrf.mxu1 }
 0x162   :  { %v1387_v37 = vadd.f32 %v1386_v9, %v1379_v45  ;;  %v1380_v46 = vand.u32 2147483647, %v1250_v34  ;;  %v1382_v49 = vand.u32 2147483647, %v1291_v35 }
 0x163   :  { %v1252_v36 = vpop.f32.mrf.mxu0  ;;  %v1293_v39 = vpop.f32.mrf.mxu1 }
 0x164   :  { %v1388_v48 = vadd.f32 %v1387_v37, %v1380_v46 }
 0x165   :  { %v1253_v40 = vpop.f32.mrf.mxu0  ;;  %v1294_v41 = vpop.f32.mrf.mxu1 }
 0x166   :  { %v1389_v50 = vadd.f32 %v1388_v48, %v1381_v47 }
 0x168   :  { %v1390_v42 = vadd.f32 %v1389_v50, %v1382_v49 }
 0x17f   :  { %v1330_v51 = vpop.f32.mrf.mxu0  ;;  %v1371_v38 = vpop.f32.mrf.mxu1 }
 0x180   :  { %v1383_v52 = vand.u32 2147483647, %v1330_v51  ;;  %v1385_v56 = vand.u32 2147483647, %v1371_v38 }
 0x181   :  { %v1332_v53 = vpop.f32.mrf.mxu0  ;;  %v3187_v54 = vpop.f32.mrf.mxu1 }
 0x182   :  { %v1391_v55 = vadd.f32 %v1390_v42, %v1383_v52  ;;  %v1384_v57 = vand.u32 2147483647, %v1332_v53 }
 0x183   :  { %v1334_v58 = vpop.f32.mrf.mxu0  ;;  %v1374_v59 = vpop.f32.mrf.mxu1 }
 0x184   :  { %v1392_v60 = vadd.f32 %v1391_v55, %v1384_v57 }
 0x185   :  { %v1335_v61 = vpop.f32.mrf.mxu0  ;;  %v3188_v62 = vpop.f32.mrf.mxu1 }
 0x186   :  { %v1393_v63 = vadd.f32 %v1392_v60, %v1385_v56 }
 0x188   :  { %1394 = vadd.xlane.f32.xlu0 %v1393_v63 }
 0x18c   :  { %2782 = vadd.xlane.f32.xlu0 %v2781_v14 }
 0x19f   :  { %v1886_v1 = vpop.f32.mrf.mxu0  ;;  %v1927_v2 = vpop.f32.mrf.mxu1 }
 0x1a0   :  { %v2056_v22 = vand.u32 2147483647, %v1886_v1  ;;  %v2058_v24 = vand.u32 2147483647, %v1927_v2 }
 0x1a1   :  { %v1888_v3 = vpop.f32.mrf.mxu0  ;;  %v1929_v4 = vpop.f32.mrf.mxu1 }
 0x1a2   :  { %v2057_v23 = vand.u32 2147483647, %v1888_v3  ;;  %v2059_v26 = vand.u32 2147483647, %v1929_v4 }
 0x1a3   :  { %v1890_v7 = vpop.f32.mrf.mxu0  ;;  %v1931_v8 = vpop.f32.mrf.mxu1 }
 0x1a4   :  { %v2065_v25 = vadd.f32 %v2057_v23, %v2056_v22 }
 0x1a5   :  { %v1891_v12 = vpop.f32.mrf.mxu0  ;;  %v1932_v13 = vpop.f32.mrf.mxu1 }
 0x1a6   :  { %v2066_v27 = vadd.f32 %v2065_v25, %v2058_v24 }
 0x1a8   :  { %v2067_v31 = vadd.f32 %v2066_v27, %v2059_v26 }
 0x1bf   :  { %v1968_v15 = vpop.f32.mrf.mxu0  ;;  %v2009_v16 = vpop.f32.mrf.mxu1 }
 0x1c0   :  { %v2060_v29 = vand.u32 2147483647, %v1968_v15  ;;  %v2062_v40 = vand.u32 2147483647, %v2009_v16 }
 0x1c1   :  { %v1970_v17 = vpop.f32.mrf.mxu0  ;;  %v2011_v18 = vpop.f32.mrf.mxu1 }
 0x1c2   :  { %v2068_v34 = vadd.f32 %v2067_v31, %v2060_v29  ;;  %v2061_v35 = vand.u32 2147483647, %v1970_v17  ;;  %v2063_v44 = vand.u32 2147483647, %v2011_v18 }
 0x1c3   :  { %v1972_v0 = vpop.f32.mrf.mxu0  ;;  %v2013_v19 = vpop.f32.mrf.mxu1 }
 0x1c4   :  { %v2069_v41 = vadd.f32 %v2068_v34, %v2061_v35 }
 0x1c5   :  { %v1973_v20 = vpop.f32.mrf.mxu0  ;;  %v2014_v21 = vpop.f32.mrf.mxu1 }
 0x1c6   :  { %v2070_v45 = vadd.f32 %v2069_v41, %v2062_v40 }
 0x1c8   :  { %v2071_v47 = vadd.f32 %v2070_v45, %v2063_v44 }
 0x1ce   :  { %v716_v33 = vpop.xlane.xlu0 %715 }
 0x1cf   :  { %v717_v28 = vrot.slane %v716_v33, 4 }
 0x1d1   :  { %v718_v30 = vadd.f32 %v717_v28, %v716_v33 }
 0x1d3   :  { %v719_v32 = vrot.slane %v718_v30, 2 }
 0x1d5   :  { %v720_v36 = vadd.f32 %v719_v32, %v718_v30 }
 0x1d7   :  { %v721_v39 = vrot.slane %v720_v36, 1 }
 0x1d9   :  { %v722_v43 = vadd.f32 %v721_v39, %v720_v36 }
 0x1db   :  { %3229 = vpush %v722_v43 }
 0x1df   :  { %v2050_v9 = vpop.f32.mrf.mxu0  ;;  %v2565_v37 = vpop.f32.mrf.mxu1 }
 0x1e0   :  { %v2064_v46 = vand.u32 2147483647, %v2050_v9  ;;  %v2735_v61 = vand.u32 2147483647, %v2565_v37 }
 0x1e1   :  { %v3207_v48 = vpop.f32.mrf.mxu0  ;;  %v2567_v49 = vpop.f32.mrf.mxu1 }
 0x1e2   :  { %v2072_v50 = vadd.f32 %v2071_v47, %v2064_v46  ;;  %v2736_v62 = vand.u32 2147483647, %v2567_v49 }
 0x1e3   :  { %v2053_v51 = vpop.f32.mrf.mxu0  ;;  %v2569_v38 = vpop.f32.mrf.mxu1 }
 0x1e4   :  { %2073 = vadd.xlane.f32.xlu1 %v2072_v50  ;;  %v2744_v2 = vadd.f32 %v2736_v62, %v2735_v61 }
 0x1e5   :  { %v3208_v42 = vpop.f32.mrf.mxu0  ;;  %v2570_v52 = vpop.f32.mrf.mxu1 }
 0x1ff   :  { %v2606_v53 = vpop.f32.mrf.mxu0  ;;  %v2647_v54 = vpop.f32.mrf.mxu1 }
 0x200   :  { %v2737_v63 = vand.u32 2147483647, %v2606_v53  ;;  %v2739_v8 = vand.u32 2147483647, %v2647_v54 }
 0x201   :  { %v2608_v55 = vpop.f32.mrf.mxu0  ;;  %v2649_v56 = vpop.f32.mrf.mxu1 }
 0x202   :  { %v2745_v4 = vadd.f32 %v2744_v2, %v2737_v63  ;;  %v2738_v5 = vand.u32 2147483647, %v2608_v55  ;;  %v2740_v14 = vand.u32 2147483647, %v2649_v56 }
 0x203   :  { %v2610_v57 = vpop.f32.mrf.mxu0  ;;  %v2651_v58 = vpop.f32.mrf.mxu1 }
 0x204   :  { %v2746_v11 = vadd.f32 %v2745_v4, %v2738_v5 }
 0x205   :  { %v2611_v59 = vpop.f32.mrf.mxu0  ;;  %v2652_v60 = vpop.f32.mrf.mxu1 }
 0x206   :  { %v2747_v15 = vadd.f32 %v2746_v11, %v2739_v8  ;;  %v2762_v59 = vlaneseq }
 0x208   :  { %v2748_v0 = vadd.f32 %v2747_v15, %v2740_v14  ;;  %v2763_v60 = vshrl.u32 %v2762_v59, 7  ;;  %v2765_v61 = vand.u32 127, %v2762_v59 }
 0x20a   :  { %vm2766_vm1 = vcmp.eq.s32.totalorder %v2763_v60, 0  ;;  %vm2767_vm2 = vcmp.eq.s32.totalorder %v2765_v61, 0  ;;  %vm2769_vm3 = vcmp.eq.s32.totalorder %v2765_v61, 1 }
 0x20b   :  { %vm2768_vm4 = vmand %vm2766_vm1, %vm2767_vm2 }
 0x20c   :  { %s3230_s0 = spop %3229  ;;  %vm2770_vm5 = vmand %vm2766_vm1, %vm2769_vm3 }
 0x211   :  { %v1395_v1 = vpop.xlane.xlu0 %1394 }
 0x212   :  { %v1396_v3 = vrot.slane %v1395_v1, 4 }
 0x214   :  { %v1397_v6 = vadd.f32 %v1396_v3, %v1395_v1 }
 0x215   :  { %v2783_v40 = vpop.xlane.xlu0 %2782 }
 0x216   :  { %v1398_v7 = vrot.slane %v1397_v6, 2  ;;  %v2784_v41 = vrot.slane %v2783_v40, 4 }
 0x218   :  { %v1399_v12 = vadd.f32 %v1398_v7, %v1397_v6  ;;  %v2785_v43 = vadd.f32 %v2784_v41, %v2783_v40 }
 0x21a   :  { %v1400_v13 = vrot.slane %v1399_v12, 1  ;;  %v2786_v44 = vrot.slane %v2785_v43, 2 }
 0x21c   :  { %v1401_v16 = vadd.f32 %v1400_v13, %v1399_v12  ;;  %v2787_v46 = vadd.f32 %v2786_v44, %v2785_v43 }
 0x21e   :  { %3231 = vpush %v1401_v16  ;;  %v2788_v51 = vrot.slane %v2787_v46, 1 }
 0x21f   :  { %v2688_v17 = vpop.f32.mrf.mxu0  ;;  %v2729_v18 = vpop.f32.mrf.mxu1 }
 0x220   :  { %v2741_v19 = vand.u32 2147483647, %v2688_v17  ;;  %v2743_v23 = vand.u32 2147483647, %v2729_v18  ;;  %v2789_v54 = vadd.f32 %v2788_v51, %v2787_v46 }
 0x221   :  { %v2690_v20 = vpop.f32.mrf.mxu0  ;;  %v3227_v21 = vpop.f32.mrf.mxu1 }
 0x222   :  { %v2749_v22 = vadd.f32 %v2748_v0, %v2741_v19  ;;  %v2742_v24 = vand.u32 2147483647, %v2690_v20 }
 0x223   :  { %v2692_v25 = vpop.f32.mrf.mxu0  ;;  %v2732_v26 = vpop.f32.mrf.mxu1 }
 0x224   :  { %v2750_v27 = vadd.f32 %v2749_v22, %v2742_v24 }
 0x225   :  { %v2693_v33 = vpop.f32.mrf.mxu0  ;;  %v3228_v28 = vpop.f32.mrf.mxu1 }
 0x226   :  { %v2751_v29 = vadd.f32 %v2750_v27, %v2743_v23 }
 0x228   :  { %2752 = vadd.xlane.f32.xlu1 %v2751_v29 }
 0x22c   :  { %2791 = vadd.xlane.f32.xlu1 %v3878_v10 }
 0x24f   :  { %s3232_s1 = spop %3231 }
 0x250   :  { %s1403_s27 = sadd.f32 %s3232_s1, %s3230_s0 }
 0x26d   :  { %v2074_v30 = vpop.xlane.xlu1 %2073 }
 0x26e   :  { %v2075_v31 = vrot.slane %v2074_v30, 4 }
 0x270   :  { %v2076_v32 = vadd.f32 %v2075_v31, %v2074_v30 }
 0x272   :  { %v2077_v34 = vrot.slane %v2076_v32, 2 }
 0x274   :  { %v2078_v35 = vadd.f32 %v2077_v34, %v2076_v32 }
 0x276   :  { %v2079_v36 = vrot.slane %v2078_v35, 1 }
 0x278   :  { %v2080_v39 = vadd.f32 %v2079_v36, %v2078_v35 }
 0x27a   :  { %3233 = vpush %v2080_v39 }
 0x2ab   :  { %s3234_s23 = spop %3233 }
 0x2ac   :  { %s2082_s28 = sadd.f32 %s3234_s23, %s1403_s27 }
 0x2b1   :  { %v2753_v45 = vpop.xlane.xlu1 %2752 }
 0x2b2   :  { %v2754_v9 = vrot.slane %v2753_v45, 4 }
 0x2b4   :  { %v2755_v37 = vadd.f32 %v2754_v9, %v2753_v45 }
 0x2b5   :  { %v2792_v47 = vpop.xlane.xlu1 %2791 }
 0x2b6   :  { %v2756_v48 = vrot.slane %v2755_v37, 2  ;;  %v2793_v49 = vrot.slane %v2792_v47, 4 }
 0x2b8   :  { %v2794_v10 = vadd.f32 %v2793_v49, %v2792_v47  ;;  %v2757_v50 = vadd.f32 %v2756_v48, %v2755_v37 }
 0x2ba   :  { %v2795_v38 = vrot.slane %v2794_v10, 2  ;;  %v2758_v42 = vrot.slane %v2757_v50, 1 }
 0x2bc   :  { %v2796_v52 = vadd.f32 %v2795_v38, %v2794_v10  ;;  %v2759_v53 = vadd.f32 %v2758_v42, %v2757_v50 }
 0x2be   :  { %3235 = vpush %v2759_v53  ;;  %v2797_v55 = vrot.slane %v2796_v52, 1 }
 0x2bf   :  { %3237 = vpush %v2789_v54 }
 0x2c0   :  { %v2798_v56 = vadd.f32 %v2797_v55, %v2796_v52 }
 0x2c2   :  { %3239 = vpush %v2798_v56 }
 0x2ef   :  { %s3236_s24 = spop %3235 }
 0x2f0   :  { %s3238_s25 = spop %3237  ;;  %s2761_s29 = sadd.f32 %s3236_s24, %s2082_s28 }
 0x2f2   :  { %v2771_v62 = vstv %s2761_s29 }
 0x2f3   :  { %s3240_s26 = spop %3239  ;;  %v2772_v1 = vsel %vm2768_vm4, %v2771_v62, 0.0 }
 0x2f4   :  { %v2800_v57 = vstv %s3240_s26 }
 0x2f5   :  { %3669 = vrcp.f32 %v2800_v57 }
 0x302   :  { %v3670_v58 = vpop.eup %3669 }
 0x303   :  { %3241 = vpush %v3670_v58 }
 0x334   :  { %s3242_s30 = spop %3241 }
 0x335   :  { %s2803_s3 = smul.f32 %s3242_s30, %s3238_s25 }
 0x337   :  { %v2805_v63 = vstv %s2803_s3 }
 0x338   :  { %v2806_v2 = vsel %vm2770_vm5, %v2805_v63, 0.0 }
 0x339   :  { %v2807_v3 = vadd.f32 %v2806_v2, %v2772_v1 }
 0x33b   :  { %2808 = vst [vmem:[#allocation7] sm:$0xff] %v2807_v3 }
 0x33c   :  { %3723 = shalt.err (!%p3720_p0)
}
 0x33d   :  { %2818 = dma.vmem_to_hbm [thread:$0]  %s2816_s5, 128, %s3888_s2, [#allocation4]  }
 0x33e   :  { %3736 = dma.done.wait [#allocation4], 128  }
 0x33f   :  { %3737 = vsyncadd [#allocation4], 4294967168 }
 0x340   :  { %2822 = vsyncpa [#allocation3], 1 }
 0x341   :  { %2823 = vsyncpa [#allocation6], 1 }
 0x342   :  { %2824 = vsyncpa [#allocation4], 1 }

</bundles_post_ra>
